<compile_context>
chip_gen: v7x
topology: tpu7x:2x2x1
jax: 0.10.0
libtpu: 0.0.40
codegen_flags: <defaults>
</compile_context>

<pallas_src>
import jax
import jax.numpy as jnp
import numpy as np
from jax import lax
from jax.experimental import pallas as pl
from jax.experimental.pallas import tpu as pltpu  # noqa: F401

# ---------------- problem sizes (small, consistent with the module) ----------------
B, S, H = 2, 8, 32            # batch, seq (mem is None -> key len == query len), hidden_dim
NH, HD = 4, 8                 # n_heads, head_dim
D = NH * HD                   # 32 = n_heads * head_dim
P = 64                        # projection_dim of the feed-forward
BS = B * S
SCALE = 1.0 / (HD ** 0.5)
EPS = 1e-5                    # torch nn.LayerNorm default
NEG = -1e30                   # finite "-inf" for the additive attention mask


def _ln(x, g, b):
    mu = jnp.mean(x, axis=-1, keepdims=True)
    var = jnp.mean((x - mu) ** 2, axis=-1, keepdims=True)
    return (x - mu) * lax.rsqrt(var + EPS) * g + b


def _shift_selector():
    """Compile-time (S, S, 2S) selector implementing Rel_Multihead_Att._left_shift.

    For source slab bd_wide = [bd | bd_next] (lane-concatenated, bd_next[q] = bd[q+1]):
      shifted[q, k] = sum_j bd_wide[q, j] * sel[q, k, j]
    reproduces exactly:
      shifted[q, k] = bd[q, k+S-1-q]   for k <= q         (part A)
      shifted[q, q+1] = 0
      shifted[q, k] = bd[q+1, k-q-2]   for k >= q+2       (part B, the wrap-around artifact)
    multiplied by tril(ones, ks - bs)  (the original code's quirky diagonal offset).
    """
    rk = lax.broadcasted_iota(jnp.int32, (S, 2 * S), 0)   # k index (rows)
    cj = lax.broadcasted_iota(jnp.int32, (S, 2 * S), 1)   # j2 index (0..S-1: bd, S..2S-1: bd_next)
    planes = []
    for q in range(S):
        part_a = (cj == rk + (S - 1 - q)) & (cj < S)       # j = k + S - 1 - q   (implies k <= q)
        part_b = (cj == rk + (S - 2 - q)) & (cj >= S)      # j-S = k - q - 2     (implies k >= q+2)
        keep = rk <= q + (S - B)                           # tril(ones, ks - bs)
        planes.append(((part_a | part_b) & keep).astype(jnp.float32))
    return jnp.stack(planes, axis=0)                       # indexed [q, k, j2]


# ---------------- single fused kernel ----------------
def _block_kernel(xf_ref, pos_ref, w_in_ref, w_mid_ref, w2_ref, vec_ref, mask_ref, out_ref):
    f32 = jnp.float32

    xf = xf_ref[...]                       # (BS, H)
    pos = pos_ref[...]                     # (S, H)
    w_in = w_in_ref[...]                   # (H, 4D)   columns: [Wk | Wv | Wq | Wr]
    w_mid = w_mid_ref[...]                 # (D, H+P)  columns: [Wo | W1]  (valid because D == H)
    w2 = w2_ref[...]                       # (P, H)
    maskadd = mask_ref[...]                # (S, S) additive mask (NEG on masked positions)
    vecs = vec_ref[...]                    # (8, P) packed small vectors

    rw = vecs[0:1, :D]
    rr = vecs[1:2, :D]
    ln1_g, ln1_b = vecs[2:3, :H], vecs[3:4, :H]
    b1 = vecs[4:5, :]                      # (1, P)
    b2 = vecs[5:6, :H]
    ln2_g, ln2_b = vecs[6:7, :H], vecs[7:8, :H]

    # ---- one fused projection matmul for key / value / query / rel ----
    stacked = jnp.concatenate([xf, pos], axis=0)                        # (BS+S, H)
    proj = jnp.dot(stacked, w_in, preferred_element_type=f32)           # (BS+S, 4D)
    key = proj[:BS, 0:D]
    val = proj[:BS, D:2 * D]
    q = proj[:BS, 2 * D:3 * D]
    rel = proj[BS:, 3 * D:]                                             # (S, D)
    rwq = q + rw
    rrq = q + rr

    sel = _shift_selector()                                             # (S, S, 2S), constant

    # ---- attention: tiny per-(batch, head) score matmuls; epilogue hoisted out of the loop ----
    head_cols = []
    for n in range(NH):
        hsl = slice(n * HD, (n + 1) * HD)
        rel_n = rel[:, hsl]                                             # (S, HD)
        # BD for BOTH batches at once: (BS, S)
        bd_all = lax.dot_general(rrq[:, hsl], rel_n, (((1,), (1,)), ((), ())),
                                 preferred_element_type=f32)
        # row q -> row q+1 (wrapped rows are never selected by the selector)
        bd_nxt = jnp.concatenate([bd_all[1:], bd_all[:1]], axis=0)
        bd_wide = jnp.concatenate([bd_all, bd_nxt], axis=1)             # (BS, 2S)
        batch_rows = []
        for b in range(B):
            rows = slice(b * S, (b + 1) * S)
            k_bn = key[rows, hsl]                                       # (S, HD)
            v_bn = val[rows, hsl]
            ac = lax.dot_general(rwq[rows, hsl], k_bn, (((1,), (1,)), ((), ())),
                                 preferred_element_type=f32)            # (S, S)
            # exact in-kernel _left_shift: one masked lane reduction, direct (q, k) orientation
            bd_shift = jnp.sum(bd_wide[rows][:, None, :] * sel, axis=-1)  # (S, S)
            s = (ac + bd_shift) * SCALE + maskadd
            m = jnp.max(s, axis=-1, keepdims=True)
            e = jnp.exp(s - m)
            p = e / jnp.sum(e, axis=-1, keepdims=True)
            batch_rows.append(jnp.dot(p, v_bn, preferred_element_type=f32))  # (S, HD)
        head_cols.append(jnp.concatenate(batch_rows, axis=0))           # (BS, HD)
    attended = jnp.concatenate(head_cols, axis=1)                       # (BS, D)

    # ---- epilogue, hoisted out of the batch loop (runs once at M = BS) ----
    # dropout / dropatt are identity in eval mode
    attn_out = jnp.dot(attended, w_mid[:, :H], preferred_element_type=f32)       # o_net
    h1 = _ln(xf + attn_out, ln1_g, ln1_b)                                        # post-LN attn
    ff = jnp.maximum(jnp.dot(h1, w_mid[:, H:], preferred_element_type=f32) + b1, 0.0)
    ff = jnp.dot(ff, w2, preferred_element_type=f32) + b2
    out_ref[...] = _ln(h1 + ff, ln2_g, ln2_b)                                    # post-LN FF


# ---------------- host-side, once per parameter set (outside the per-call jitted path) ---------
def pack_operands(pos_emb, rr_bias, rw_bias, mask, params):
    f32 = jnp.float32

    def pad_row(v):  # (.., n) -> (1, P)
        v = jnp.asarray(v, f32).reshape(1, -1)
        return jnp.pad(v, ((0, 0), (0, P - v.shape[1])))

    w_in = jnp.concatenate([params["wkv"], params["wq"], params["wr"]], axis=1).astype(f32)
    w_mid = jnp.concatenate([params["wo"], params["w1"]], axis=1).astype(f32)
    w2 = jnp.asarray(params["w2"], f32)
    vecs = jnp.concatenate([
        pad_row(rw_bias), pad_row(rr_bias),
        pad_row(params["ln1_g"]), pad_row(params["ln1_b"]),
        jnp.asarray(params["b1"], f32).reshape(1, P),
        pad_row(params["b2"]), pad_row(params["ln2_g"]), pad_row(params["ln2_b"]),
    ], axis=0)                                                                   # (8, P)
    maskadd = jnp.asarray(mask, f32) * jnp.float32(NEG)                          # (S, S)
    return jnp.asarray(pos_emb, f32), w_in, w_mid, w2, vecs, maskadd


# ---------------- per-call wrapper: one pallas_call, whole problem resident in VMEM -----------
@jax.jit
def transformer_block_forward(x, pos_emb, w_in, w_mid, w2, vecs, maskadd):
    out_flat = pl.pallas_call(
        _block_kernel,
        out_shape=jax.ShapeDtypeStruct((BS, H), jnp.float32),
    )(x.reshape(BS, H), pos_emb, w_in, w_mid, w2, vecs, maskadd)
    return out_flat.reshape(B, S, H)


# ---------------- pure-JAX reference (mirrors the torch forward exactly) ----------------
def _left_shift(x):  # x: (bs, qs, ks, nh) — verbatim replica of Rel_Multihead_Att._left_shift
    bs, qs, ks, nh = x.shape
    zero_pad = jnp.zeros((bs, qs, 1, nh), dtype=x.dtype)
    x_padded = jnp.concatenate([zero_pad, x], axis=2)
    x_padded = x_padded.reshape(bs, ks + 1, qs, nh)
    x = x_padded[:, 1:].reshape(bs, qs, ks, nh)
    ones = jnp.ones((qs, ks), dtype=x.dtype)
    tril = jnp.tril(ones, ks - bs)            # reproduces the original code verbatim
    return x * tril[None, :, :, None]


def reference(x, pos_emb, rr_bias, rw_bias, mask, params):
    c = x                                        # mem is None -> cat([mem, x]) == x
    kv = c @ params["wkv"]
    key, value = kv[..., :D], kv[..., D:]
    q = x @ params["wq"]
    rel = pos_emb @ params["wr"]
    k4 = key.reshape(B, S, NH, HD)
    v4 = value.reshape(B, S, NH, HD)
    q4 = q.reshape(B, S, NH, HD)
    r3 = rel.reshape(S, NH, HD)
    AC = jnp.einsum("bqnd,bknd->bqkn", q4 + rw_bias[None, None], k4)
    BD = jnp.einsum("bqnd,knd->bqkn", q4 + rr_bias[None, None], r3)
    BD = _left_shift(BD)
    att = (AC + BD) * SCALE
    att = jnp.where(mask.astype(bool)[None, :, :, None], -jnp.inf, att)
    prob = jax.nn.softmax(att, axis=2)
    attended = jnp.einsum("bqkn,bknd->bqnd", prob, v4).reshape(B, S, D)
    out = x + attended @ params["wo"]
    out = _ln(out, params["ln1_g"], params["ln1_b"])
    ff = jnp.maximum(out @ params["w1"] + params["b1"], 0.0) @ params["w2"] + params["b2"]
    return _ln(out + ff, params["ln2_g"], params["ln2_b"])


if __name__ == "__main__":
    f32 = jnp.float32
    key = jax.random.PRNGKey(0)
    keys = jax.random.split(key, 14)

    def rnd(k, shape, scale):
        return (scale * jax.random.normal(k, shape)).astype(f32)

    params = dict(
        wkv=rnd(keys[0], (H, 2 * D), 0.05),
        wq=rnd(keys[1], (H, D), 0.05),
        wr=rnd(keys[2], (H, D), 0.05),
        wo=rnd(keys[3], (D, H), 0.05),
        ln1_g=(1.0 + rnd(keys[4], (1, H), 0.1)),
        ln1_b=rnd(keys[5], (1, H), 0.1),
        w1=rnd(keys[6], (H, P), 0.05),
        b1=rnd(keys[7], (1, P), 0.05),
        w2=rnd(keys[8], (P, H), 0.05),
        b2=rnd(keys[9], (1, H), 0.05),
        ln2_g=(1.0 + rnd(keys[10], (1, H), 0.1)),
        ln2_b=rnd(keys[11], (1, H), 0.1),
    )
    x = jax.random.normal(keys[12], (B, S, H), f32)
    pos_emb = jax.random.normal(keys[13], (S, H), f32)
    rr_bias = rnd(keys[4], (NH, HD), 0.1)
    rw_bias = rnd(keys[5], (NH, HD), 0.1)
    # mask[q,k] = 1/True means "fill with -inf" (mask out future positions)
    mask = jnp.triu(jnp.ones((S, S), jnp.int32), 1)

    # parameter packing done ONCE, outside the jitted per-call path
    pos_p, w_in, w_mid, w2, vecs, maskadd = pack_operands(pos_emb, rr_bias, rw_bias, mask, params)

    out = transformer_block_forward(x, pos_p, w_in, w_mid, w2, vecs, maskadd)
    out = jax.block_until_ready(out)

    ref = reference(x, pos_emb, rr_bias, rw_bias, mask, params)
    np.testing.assert_allclose(np.asarray(out), np.asarray(ref), atol=5e-3, rtol=5e-3)
    print("KERNEL_OK")
</pallas_src>

<mosaic_0001>
module attributes {stable_mosaic.version = 11 : i64} {
  func.func @_block_kernel(%arg0: memref<16x32xf32, #tpu.memory_space<vmem>>, %arg1: memref<8x32xf32, #tpu.memory_space<vmem>>, %arg2: memref<32x128xf32, #tpu.memory_space<vmem>>, %arg3: memref<32x96xf32, #tpu.memory_space<vmem>>, %arg4: memref<64x32xf32, #tpu.memory_space<vmem>>, %arg5: memref<8x64xf32, #tpu.memory_space<vmem>>, %arg6: memref<8x8xf32, #tpu.memory_space<vmem>>, %arg7: memref<16x32xf32, #tpu.memory_space<vmem>>) attributes {dimension_semantics = [], scalar_prefetch = 0 : i64, scratch_operands = 0 : i64, tpu.core_type = #tpu.core_type<tc>} {
    %c0 = arith.constant 0 : index
    %c0_0 = arith.constant 0 : index
    %0 = vector.load %arg0[%c0, %c0_0] : memref<16x32xf32, #tpu.memory_space<vmem>>, vector<16x32xf32>
    %c0_1 = arith.constant 0 : index
    %c0_2 = arith.constant 0 : index
    %1 = vector.load %arg1[%c0_1, %c0_2] : memref<8x32xf32, #tpu.memory_space<vmem>>, vector<8x32xf32>
    %c0_3 = arith.constant 0 : index
    %c0_4 = arith.constant 0 : index
    %2 = vector.load %arg2[%c0_3, %c0_4] : memref<32x128xf32, #tpu.memory_space<vmem>>, vector<32x128xf32>
    %c0_5 = arith.constant 0 : index
    %c0_6 = arith.constant 0 : index
    %3 = vector.load %arg3[%c0_5, %c0_6] : memref<32x96xf32, #tpu.memory_space<vmem>>, vector<32x96xf32>
    %c0_7 = arith.constant 0 : index
    %c0_8 = arith.constant 0 : index
    %4 = vector.load %arg4[%c0_7, %c0_8] : memref<64x32xf32, #tpu.memory_space<vmem>>, vector<64x32xf32>
    %c0_9 = arith.constant 0 : index
    %c0_10 = arith.constant 0 : index
    %5 = vector.load %arg6[%c0_9, %c0_10] : memref<8x8xf32, #tpu.memory_space<vmem>>, vector<8x8xf32>
    %c0_11 = arith.constant 0 : index
    %c0_12 = arith.constant 0 : index
    %6 = vector.load %arg5[%c0_11, %c0_12] : memref<8x64xf32, #tpu.memory_space<vmem>>, vector<8x64xf32>
    %7 = vector.extract_strided_slice %6 {offsets = [0, 0], sizes = [1, 32], strides = [1, 1]} : vector<8x64xf32> to vector<1x32xf32>
    %8 = vector.extract_strided_slice %6 {offsets = [1, 0], sizes = [1, 32], strides = [1, 1]} : vector<8x64xf32> to vector<1x32xf32>
    %9 = vector.extract_strided_slice %6 {offsets = [2, 0], sizes = [1, 32], strides = [1, 1]} : vector<8x64xf32> to vector<1x32xf32>
    %10 = vector.extract_strided_slice %6 {offsets = [3, 0], sizes = [1, 32], strides = [1, 1]} : vector<8x64xf32> to vector<1x32xf32>
    %11 = vector.extract_strided_slice %6 {offsets = [4, 0], sizes = [1, 64], strides = [1, 1]} : vector<8x64xf32> to vector<1x64xf32>
    %12 = vector.extract_strided_slice %6 {offsets = [5, 0], sizes = [1, 32], strides = [1, 1]} : vector<8x64xf32> to vector<1x32xf32>
    %13 = vector.extract_strided_slice %6 {offsets = [6, 0], sizes = [1, 32], strides = [1, 1]} : vector<8x64xf32> to vector<1x32xf32>
    %14 = vector.extract_strided_slice %6 {offsets = [7, 0], sizes = [1, 32], strides = [1, 1]} : vector<8x64xf32> to vector<1x32xf32>
    %15 = tpu.concatenate %0, %1 in 0 : vector<16x32xf32>, vector<8x32xf32> -> vector<24x32xf32>
    %cst = arith.constant dense<0.000000e+00> : vector<24x128xf32>
    %16 = tpu.matmul %15, %2, %cst {dimension_numbers = #tpu.dot_dimension_numbers<[1], [0], [0], [1], [0, 0, 1, 1], [], []>} : vector<24x32xf32>, vector<32x128xf32>, vector<24x128xf32> -> vector<24x128xf32>
    %17 = vector.extract_strided_slice %16 {offsets = [0, 0], sizes = [16, 32], strides = [1, 1]} : vector<24x128xf32> to vector<16x32xf32>
    %18 = vector.extract_strided_slice %16 {offsets = [0, 32], sizes = [16, 32], strides = [1, 1]} : vector<24x128xf32> to vector<16x32xf32>
    %19 = vector.extract_strided_slice %16 {offsets = [0, 64], sizes = [16, 32], strides = [1, 1]} : vector<24x128xf32> to vector<16x32xf32>
    %20 = vector.extract_strided_slice %16 {offsets = [16, 96], sizes = [8, 32], strides = [1, 1]} : vector<24x128xf32> to vector<8x32xf32>
    %21 = vector.broadcast %7 : vector<1x32xf32> to vector<16x32xf32>
    %22 = arith.addf %19, %21 : vector<16x32xf32>
    %23 = vector.broadcast %8 : vector<1x32xf32> to vector<16x32xf32>
    %24 = arith.addf %19, %23 : vector<16x32xf32>
    %25 = tpu.iota {dimensions = array<i32: 0>} : vector<8x16xi32>
    %26 = tpu.iota {dimensions = array<i32: 1>} : vector<8x16xi32>
    %c7_i32 = arith.constant 7 : i32
    %27 = vector.broadcast %c7_i32 : i32 to vector<8x16xi32>
    %28 = arith.addi %25, %27 : vector<8x16xi32>
    %29 = arith.cmpi eq, %26, %28 : vector<8x16xi32>
    %c8_i32 = arith.constant 8 : i32
    %30 = vector.broadcast %c8_i32 : i32 to vector<8x16xi32>
    %31 = arith.cmpi slt, %26, %30 : vector<8x16xi32>
    %32 = arith.andi %29, %31 : vector<8x16xi1>
    %c6_i32 = arith.constant 6 : i32
    %33 = vector.broadcast %c6_i32 : i32 to vector<8x16xi32>
    %34 = arith.addi %25, %33 : vector<8x16xi32>
    %35 = arith.cmpi eq, %26, %34 : vector<8x16xi32>
    %c8_i32_13 = arith.constant 8 : i32
    %36 = vector.broadcast %c8_i32_13 : i32 to vector<8x16xi32>
    %37 = arith.cmpi sge, %26, %36 : vector<8x16xi32>
    %38 = arith.andi %35, %37 : vector<8x16xi1>
    %c6_i32_14 = arith.constant 6 : i32
    %39 = vector.broadcast %c6_i32_14 : i32 to vector<8x16xi32>
    %40 = arith.cmpi sle, %25, %39 : vector<8x16xi32>
    %41 = arith.ori %32, %38 : vector<8x16xi1>
    %42 = arith.andi %41, %40 : vector<8x16xi1>
    %43 = arith.extui %42 : vector<8x16xi1> to vector<8x16xi32>
    %44 = arith.sitofp %43 : vector<8x16xi32> to vector<8x16xf32>
    %c6_i32_15 = arith.constant 6 : i32
    %45 = vector.broadcast %c6_i32_15 : i32 to vector<8x16xi32>
    %46 = arith.addi %25, %45 : vector<8x16xi32>
    %47 = arith.cmpi eq, %26, %46 : vector<8x16xi32>
    %c8_i32_16 = arith.constant 8 : i32
    %48 = vector.broadcast %c8_i32_16 : i32 to vector<8x16xi32>
    %49 = arith.cmpi slt, %26, %48 : vector<8x16xi32>
    %50 = arith.andi %47, %49 : vector<8x16xi1>
    %c5_i32 = arith.constant 5 : i32
    %51 = vector.broadcast %c5_i32 : i32 to vector<8x16xi32>
    %52 = arith.addi %25, %51 : vector<8x16xi32>
    %53 = arith.cmpi eq, %26, %52 : vector<8x16xi32>
    %c8_i32_17 = arith.constant 8 : i32
    %54 = vector.broadcast %c8_i32_17 : i32 to vector<8x16xi32>
    %55 = arith.cmpi sge, %26, %54 : vector<8x16xi32>
    %56 = arith.andi %53, %55 : vector<8x16xi1>
    %c7_i32_18 = arith.constant 7 : i32
    %57 = vector.broadcast %c7_i32_18 : i32 to vector<8x16xi32>
    %58 = arith.cmpi sle, %25, %57 : vector<8x16xi32>
    %59 = arith.ori %50, %56 : vector<8x16xi1>
    %60 = arith.andi %59, %58 : vector<8x16xi1>
    %61 = arith.extui %60 : vector<8x16xi1> to vector<8x16xi32>
    %62 = arith.sitofp %61 : vector<8x16xi32> to vector<8x16xf32>
    %c5_i32_19 = arith.constant 5 : i32
    %63 = vector.broadcast %c5_i32_19 : i32 to vector<8x16xi32>
    %64 = arith.addi %25, %63 : vector<8x16xi32>
    %65 = arith.cmpi eq, %26, %64 : vector<8x16xi32>
    %c8_i32_20 = arith.constant 8 : i32
    %66 = vector.broadcast %c8_i32_20 : i32 to vector<8x16xi32>
    %67 = arith.cmpi slt, %26, %66 : vector<8x16xi32>
    %68 = arith.andi %65, %67 : vector<8x16xi1>
    %c4_i32 = arith.constant 4 : i32
    %69 = vector.broadcast %c4_i32 : i32 to vector<8x16xi32>
    %70 = arith.addi %25, %69 : vector<8x16xi32>
    %71 = arith.cmpi eq, %26, %70 : vector<8x16xi32>
    %c8_i32_21 = arith.constant 8 : i32
    %72 = vector.broadcast %c8_i32_21 : i32 to vector<8x16xi32>
    %73 = arith.cmpi sge, %26, %72 : vector<8x16xi32>
    %74 = arith.andi %71, %73 : vector<8x16xi1>
    %c8_i32_22 = arith.constant 8 : i32
    %75 = vector.broadcast %c8_i32_22 : i32 to vector<8x16xi32>
    %76 = arith.cmpi sle, %25, %75 : vector<8x16xi32>
    %77 = arith.ori %68, %74 : vector<8x16xi1>
    %78 = arith.andi %77, %76 : vector<8x16xi1>
    %79 = arith.extui %78 : vector<8x16xi1> to vector<8x16xi32>
    %80 = arith.sitofp %79 : vector<8x16xi32> to vector<8x16xf32>
    %c4_i32_23 = arith.constant 4 : i32
    %81 = vector.broadcast %c4_i32_23 : i32 to vector<8x16xi32>
    %82 = arith.addi %25, %81 : vector<8x16xi32>
    %83 = arith.cmpi eq, %26, %82 : vector<8x16xi32>
    %c8_i32_24 = arith.constant 8 : i32
    %84 = vector.broadcast %c8_i32_24 : i32 to vector<8x16xi32>
    %85 = arith.cmpi slt, %26, %84 : vector<8x16xi32>
    %86 = arith.andi %83, %85 : vector<8x16xi1>
    %c3_i32 = arith.constant 3 : i32
    %87 = vector.broadcast %c3_i32 : i32 to vector<8x16xi32>
    %88 = arith.addi %25, %87 : vector<8x16xi32>
    %89 = arith.cmpi eq, %26, %88 : vector<8x16xi32>
    %c8_i32_25 = arith.constant 8 : i32
    %90 = vector.broadcast %c8_i32_25 : i32 to vector<8x16xi32>
    %91 = arith.cmpi sge, %26, %90 : vector<8x16xi32>
    %92 = arith.andi %89, %91 : vector<8x16xi1>
    %c9_i32 = arith.constant 9 : i32
    %93 = vector.broadcast %c9_i32 : i32 to vector<8x16xi32>
    %94 = arith.cmpi sle, %25, %93 : vector<8x16xi32>
    %95 = arith.ori %86, %92 : vector<8x16xi1>
    %96 = arith.andi %95, %94 : vector<8x16xi1>
    %97 = arith.extui %96 : vector<8x16xi1> to vector<8x16xi32>
    %98 = arith.sitofp %97 : vector<8x16xi32> to vector<8x16xf32>
    %c3_i32_26 = arith.constant 3 : i32
    %99 = vector.broadcast %c3_i32_26 : i32 to vector<8x16xi32>
    %100 = arith.addi %25, %99 : vector<8x16xi32>
    %101 = arith.cmpi eq, %26, %100 : vector<8x16xi32>
    %c8_i32_27 = arith.constant 8 : i32
    %102 = vector.broadcast %c8_i32_27 : i32 to vector<8x16xi32>
    %103 = arith.cmpi slt, %26, %102 : vector<8x16xi32>
    %104 = arith.andi %101, %103 : vector<8x16xi1>
    %c2_i32 = arith.constant 2 : i32
    %105 = vector.broadcast %c2_i32 : i32 to vector<8x16xi32>
    %106 = arith.addi %25, %105 : vector<8x16xi32>
    %107 = arith.cmpi eq, %26, %106 : vector<8x16xi32>
    %c8_i32_28 = arith.constant 8 : i32
    %108 = vector.broadcast %c8_i32_28 : i32 to vector<8x16xi32>
    %109 = arith.cmpi sge, %26, %108 : vector<8x16xi32>
    %110 = arith.andi %107, %109 : vector<8x16xi1>
    %c10_i32 = arith.constant 10 : i32
    %111 = vector.broadcast %c10_i32 : i32 to vector<8x16xi32>
    %112 = arith.cmpi sle, %25, %111 : vector<8x16xi32>
    %113 = arith.ori %104, %110 : vector<8x16xi1>
    %114 = arith.andi %113, %112 : vector<8x16xi1>
    %115 = arith.extui %114 : vector<8x16xi1> to vector<8x16xi32>
    %116 = arith.sitofp %115 : vector<8x16xi32> to vector<8x16xf32>
    %c2_i32_29 = arith.constant 2 : i32
    %117 = vector.broadcast %c2_i32_29 : i32 to vector<8x16xi32>
    %118 = arith.addi %25, %117 : vector<8x16xi32>
    %119 = arith.cmpi eq, %26, %118 : vector<8x16xi32>
    %c8_i32_30 = arith.constant 8 : i32
    %120 = vector.broadcast %c8_i32_30 : i32 to vector<8x16xi32>
    %121 = arith.cmpi slt, %26, %120 : vector<8x16xi32>
    %122 = arith.andi %119, %121 : vector<8x16xi1>
    %c1_i32 = arith.constant 1 : i32
    %123 = vector.broadcast %c1_i32 : i32 to vector<8x16xi32>
    %124 = arith.addi %25, %123 : vector<8x16xi32>
    %125 = arith.cmpi eq, %26, %124 : vector<8x16xi32>
    %c8_i32_31 = arith.constant 8 : i32
    %126 = vector.broadcast %c8_i32_31 : i32 to vector<8x16xi32>
    %127 = arith.cmpi sge, %26, %126 : vector<8x16xi32>
    %128 = arith.andi %125, %127 : vector<8x16xi1>
    %c11_i32 = arith.constant 11 : i32
    %129 = vector.broadcast %c11_i32 : i32 to vector<8x16xi32>
    %130 = arith.cmpi sle, %25, %129 : vector<8x16xi32>
    %131 = arith.ori %122, %128 : vector<8x16xi1>
    %132 = arith.andi %131, %130 : vector<8x16xi1>
    %133 = arith.extui %132 : vector<8x16xi1> to vector<8x16xi32>
    %134 = arith.sitofp %133 : vector<8x16xi32> to vector<8x16xf32>
    %c1_i32_32 = arith.constant 1 : i32
    %135 = vector.broadcast %c1_i32_32 : i32 to vector<8x16xi32>
    %136 = arith.addi %25, %135 : vector<8x16xi32>
    %137 = arith.cmpi eq, %26, %136 : vector<8x16xi32>
    %c8_i32_33 = arith.constant 8 : i32
    %138 = vector.broadcast %c8_i32_33 : i32 to vector<8x16xi32>
    %139 = arith.cmpi slt, %26, %138 : vector<8x16xi32>
    %140 = arith.andi %137, %139 : vector<8x16xi1>
    %c0_i32 = arith.constant 0 : i32
    %141 = vector.broadcast %c0_i32 : i32 to vector<8x16xi32>
    %142 = arith.addi %25, %141 : vector<8x16xi32>
    %143 = arith.cmpi eq, %26, %142 : vector<8x16xi32>
    %c8_i32_34 = arith.constant 8 : i32
    %144 = vector.broadcast %c8_i32_34 : i32 to vector<8x16xi32>
    %145 = arith.cmpi sge, %26, %144 : vector<8x16xi32>
    %146 = arith.andi %143, %145 : vector<8x16xi1>
    %c12_i32 = arith.constant 12 : i32
    %147 = vector.broadcast %c12_i32 : i32 to vector<8x16xi32>
    %148 = arith.cmpi sle, %25, %147 : vector<8x16xi32>
    %149 = arith.ori %140, %146 : vector<8x16xi1>
    %150 = arith.andi %149, %148 : vector<8x16xi1>
    %151 = arith.extui %150 : vector<8x16xi1> to vector<8x16xi32>
    %152 = arith.sitofp %151 : vector<8x16xi32> to vector<8x16xf32>
    %c0_i32_35 = arith.constant 0 : i32
    %153 = vector.broadcast %c0_i32_35 : i32 to vector<8x16xi32>
    %154 = arith.addi %25, %153 : vector<8x16xi32>
    %155 = arith.cmpi eq, %26, %154 : vector<8x16xi32>
    %c8_i32_36 = arith.constant 8 : i32
    %156 = vector.broadcast %c8_i32_36 : i32 to vector<8x16xi32>
    %157 = arith.cmpi slt, %26, %156 : vector<8x16xi32>
    %158 = arith.andi %155, %157 : vector<8x16xi1>
    %c-1_i32 = arith.constant -1 : i32
    %159 = vector.broadcast %c-1_i32 : i32 to vector<8x16xi32>
    %160 = arith.addi %25, %159 : vector<8x16xi32>
    %161 = arith.cmpi eq, %26, %160 : vector<8x16xi32>
    %c8_i32_37 = arith.constant 8 : i32
    %162 = vector.broadcast %c8_i32_37 : i32 to vector<8x16xi32>
    %163 = arith.cmpi sge, %26, %162 : vector<8x16xi32>
    %164 = arith.andi %161, %163 : vector<8x16xi1>
    %c13_i32 = arith.constant 13 : i32
    %165 = vector.broadcast %c13_i32 : i32 to vector<8x16xi32>
    %166 = arith.cmpi sle, %25, %165 : vector<8x16xi32>
    %167 = arith.ori %158, %164 : vector<8x16xi1>
    %168 = arith.andi %167, %166 : vector<8x16xi1>
    %169 = arith.extui %168 : vector<8x16xi1> to vector<8x16xi32>
    %170 = arith.sitofp %169 : vector<8x16xi32> to vector<8x16xf32>
    %171 = vector.shape_cast %44 : vector<8x16xf32> to vector<1x8x16xf32>
    %172 = vector.shape_cast %62 : vector<8x16xf32> to vector<1x8x16xf32>
    %173 = vector.shape_cast %80 : vector<8x16xf32> to vector<1x8x16xf32>
    %174 = vector.shape_cast %98 : vector<8x16xf32> to vector<1x8x16xf32>
    %175 = vector.shape_cast %116 : vector<8x16xf32> to vector<1x8x16xf32>
    %176 = vector.shape_cast %134 : vector<8x16xf32> to vector<1x8x16xf32>
    %177 = vector.shape_cast %152 : vector<8x16xf32> to vector<1x8x16xf32>
    %178 = vector.shape_cast %170 : vector<8x16xf32> to vector<1x8x16xf32>
    %179 = tpu.concatenate %171, %172, %173, %174, %175, %176, %177, %178 in 0 : vector<1x8x16xf32>, vector<1x8x16xf32>, vector<1x8x16xf32>, vector<1x8x16xf32>, vector<1x8x16xf32>, vector<1x8x16xf32>, vector<1x8x16xf32>, vector<1x8x16xf32> -> vector<8x8x16xf32>
    %180 = vector.extract_strided_slice %20 {offsets = [0, 0], sizes = [8, 8], strides = [1, 1]} : vector<8x32xf32> to vector<8x8xf32>
    %181 = vector.extract_strided_slice %24 {offsets = [0, 0], sizes = [16, 8], strides = [1, 1]} : vector<16x32xf32> to vector<16x8xf32>
    %cst_38 = arith.constant dense<0.000000e+00> : vector<16x8xf32>
    %182 = tpu.matmul %181, %180, %cst_38 {dimension_numbers = #tpu.dot_dimension_numbers<[1], [1], [0], [0], [0, 0, 1, 0], [], []>} : vector<16x8xf32>, vector<8x8xf32>, vector<16x8xf32> -> vector<16x8xf32>
    %183 = vector.extract_strided_slice %182 {offsets = [1, 0], sizes = [15, 8], strides = [1, 1]} : vector<16x8xf32> to vector<15x8xf32>
    %184 = vector.extract_strided_slice %182 {offsets = [0, 0], sizes = [1, 8], strides = [1, 1]} : vector<16x8xf32> to vector<1x8xf32>
    %185 = tpu.concatenate %183, %184 in 0 : vector<15x8xf32>, vector<1x8xf32> -> vector<16x8xf32>
    %186 = tpu.concatenate %182, %185 in 1 : vector<16x8xf32>, vector<16x8xf32> -> vector<16x16xf32>
    %187 = vector.extract_strided_slice %17 {offsets = [0, 0], sizes = [8, 8], strides = [1, 1]} : vector<16x32xf32> to vector<8x8xf32>
    %188 = vector.extract_strided_slice %18 {offsets = [0, 0], sizes = [8, 8], strides = [1, 1]} : vector<16x32xf32> to vector<8x8xf32>
    %189 = vector.extract_strided_slice %22 {offsets = [0, 0], sizes = [8, 8], strides = [1, 1]} : vector<16x32xf32> to vector<8x8xf32>
    %cst_39 = arith.constant dense<0.000000e+00> : vector<8x8xf32>
    %190 = tpu.matmul %189, %187, %cst_39 {dimension_numbers = #tpu.dot_dimension_numbers<[1], [1], [0], [0], [0, 0, 1, 0], [], []>} : vector<8x8xf32>, vector<8x8xf32>, vector<8x8xf32> -> vector<8x8xf32>
    %191 = vector.extract_strided_slice %186 {offsets = [0, 0], sizes = [8, 16], strides = [1, 1]} : vector<16x16xf32> to vector<8x16xf32>
    %192 = vector.shape_cast %191 : vector<8x16xf32> to vector<8x1x16xf32>
    %193 = vector.broadcast %192 : vector<8x1x16xf32> to vector<8x8x16xf32>
    %194 = arith.mulf %193, %179 : vector<8x8x16xf32>
    %cst_40 = arith.constant dense<0.000000e+00> : vector<8x8xf32>
    %195 = vector.multi_reduction <add>, %194, %cst_40 [2] : vector<8x8x16xf32> to vector<8x8xf32>
    %196 = arith.addf %190, %195 : vector<8x8xf32>
    %cst_41 = arith.constant 0.353553385 : f32
    %197 = vector.broadcast %cst_41 : f32 to vector<8x8xf32>
    %198 = arith.mulf %196, %197 : vector<8x8xf32>
    %199 = arith.addf %198, %5 : vector<8x8xf32>
    %cst_42 = arith.constant dense<0xFF800000> : vector<8xf32>
    %200 = vector.multi_reduction <maximumf>, %199, %cst_42 [1] : vector<8x8xf32> to vector<8xf32>
    %201 = vector.shape_cast %200 : vector<8xf32> to vector<8x1xf32>
    %202 = vector.broadcast %201 : vector<8x1xf32> to vector<8x8xf32>
    %203 = arith.subf %199, %202 : vector<8x8xf32>
    %204 = math.exp %203 : vector<8x8xf32>
    %cst_43 = arith.constant dense<0.000000e+00> : vector<8xf32>
    %205 = vector.multi_reduction <add>, %204, %cst_43 [1] : vector<8x8xf32> to vector<8xf32>
    %206 = vector.shape_cast %205 : vector<8xf32> to vector<8x1xf32>
    %207 = vector.broadcast %206 : vector<8x1xf32> to vector<8x8xf32>
    %208 = arith.divf %204, %207 : vector<8x8xf32>
    %cst_44 = arith.constant dense<0.000000e+00> : vector<8x8xf32>
    %209 = tpu.matmul %208, %188, %cst_44 {dimension_numbers = #tpu.dot_dimension_numbers<[1], [0], [0], [1], [0, 0, 1, 1], [], []>} : vector<8x8xf32>, vector<8x8xf32>, vector<8x8xf32> -> vector<8x8xf32>
    %210 = vector.extract_strided_slice %17 {offsets = [8, 0], sizes = [8, 8], strides = [1, 1]} : vector<16x32xf32> to vector<8x8xf32>
    %211 = vector.extract_strided_slice %18 {offsets = [8, 0], sizes = [8, 8], strides = [1, 1]} : vector<16x32xf32> to vector<8x8xf32>
    %212 = vector.extract_strided_slice %22 {offsets = [8, 0], sizes = [8, 8], strides = [1, 1]} : vector<16x32xf32> to vector<8x8xf32>
    %cst_45 = arith.constant dense<0.000000e+00> : vector<8x8xf32>
    %213 = tpu.matmul %212, %210, %cst_45 {dimension_numbers = #tpu.dot_dimension_numbers<[1], [1], [0], [0], [0, 0, 1, 0], [], []>} : vector<8x8xf32>, vector<8x8xf32>, vector<8x8xf32> -> vector<8x8xf32>
    %214 = vector.extract_strided_slice %186 {offsets = [8, 0], sizes = [8, 16], strides = [1, 1]} : vector<16x16xf32> to vector<8x16xf32>
    %215 = vector.shape_cast %214 : vector<8x16xf32> to vector<8x1x16xf32>
    %216 = vector.broadcast %215 : vector<8x1x16xf32> to vector<8x8x16xf32>
    %217 = arith.mulf %216, %179 : vector<8x8x16xf32>
    %cst_46 = arith.constant dense<0.000000e+00> : vector<8x8xf32>
    %218 = vector.multi_reduction <add>, %217, %cst_46 [2] : vector<8x8x16xf32> to vector<8x8xf32>
    %219 = arith.addf %213, %218 : vector<8x8xf32>
    %cst_47 = arith.constant 0.353553385 : f32
    %220 = vector.broadcast %cst_47 : f32 to vector<8x8xf32>
    %221 = arith.mulf %219, %220 : vector<8x8xf32>
    %222 = arith.addf %221, %5 : vector<8x8xf32>
    %cst_48 = arith.constant dense<0xFF800000> : vector<8xf32>
    %223 = vector.multi_reduction <maximumf>, %222, %cst_48 [1] : vector<8x8xf32> to vector<8xf32>
    %224 = vector.shape_cast %223 : vector<8xf32> to vector<8x1xf32>
    %225 = vector.broadcast %224 : vector<8x1xf32> to vector<8x8xf32>
    %226 = arith.subf %222, %225 : vector<8x8xf32>
    %227 = math.exp %226 : vector<8x8xf32>
    %cst_49 = arith.constant dense<0.000000e+00> : vector<8xf32>
    %228 = vector.multi_reduction <add>, %227, %cst_49 [1] : vector<8x8xf32> to vector<8xf32>
    %229 = vector.shape_cast %228 : vector<8xf32> to vector<8x1xf32>
    %230 = vector.broadcast %229 : vector<8x1xf32> to vector<8x8xf32>
    %231 = arith.divf %227, %230 : vector<8x8xf32>
    %cst_50 = arith.constant dense<0.000000e+00> : vector<8x8xf32>
    %232 = tpu.matmul %231, %211, %cst_50 {dimension_numbers = #tpu.dot_dimension_numbers<[1], [0], [0], [1], [0, 0, 1, 1], [], []>} : vector<8x8xf32>, vector<8x8xf32>, vector<8x8xf32> -> vector<8x8xf32>
    %233 = tpu.concatenate %209, %232 in 0 : vector<8x8xf32>, vector<8x8xf32> -> vector<16x8xf32>
    %234 = vector.extract_strided_slice %20 {offsets = [0, 8], sizes = [8, 8], strides = [1, 1]} : vector<8x32xf32> to vector<8x8xf32>
    %235 = vector.extract_strided_slice %24 {offsets = [0, 8], sizes = [16, 8], strides = [1, 1]} : vector<16x32xf32> to vector<16x8xf32>
    %cst_51 = arith.constant dense<0.000000e+00> : vector<16x8xf32>
    %236 = tpu.matmul %235, %234, %cst_51 {dimension_numbers = #tpu.dot_dimension_numbers<[1], [1], [0], [0], [0, 0, 1, 0], [], []>} : vector<16x8xf32>, vector<8x8xf32>, vector<16x8xf32> -> vector<16x8xf32>
    %237 = vector.extract_strided_slice %236 {offsets = [1, 0], sizes = [15, 8], strides = [1, 1]} : vector<16x8xf32> to vector<15x8xf32>
    %238 = vector.extract_strided_slice %236 {offsets = [0, 0], sizes = [1, 8], strides = [1, 1]} : vector<16x8xf32> to vector<1x8xf32>
    %239 = tpu.concatenate %237, %238 in 0 : vector<15x8xf32>, vector<1x8xf32> -> vector<16x8xf32>
    %240 = tpu.concatenate %236, %239 in 1 : vector<16x8xf32>, vector<16x8xf32> -> vector<16x16xf32>
    %241 = vector.extract_strided_slice %17 {offsets = [0, 8], sizes = [8, 8], strides = [1, 1]} : vector<16x32xf32> to vector<8x8xf32>
    %242 = vector.extract_strided_slice %18 {offsets = [0, 8], sizes = [8, 8], strides = [1, 1]} : vector<16x32xf32> to vector<8x8xf32>
    %243 = vector.extract_strided_slice %22 {offsets = [0, 8], sizes = [8, 8], strides = [1, 1]} : vector<16x32xf32> to vector<8x8xf32>
    %cst_52 = arith.constant dense<0.000000e+00> : vector<8x8xf32>
    %244 = tpu.matmul %243, %241, %cst_52 {dimension_numbers = #tpu.dot_dimension_numbers<[1], [1], [0], [0], [0, 0, 1, 0], [], []>} : vector<8x8xf32>, vector<8x8xf32>, vector<8x8xf32> -> vector<8x8xf32>
    %245 = vector.extract_strided_slice %240 {offsets = [0, 0], sizes = [8, 16], strides = [1, 1]} : vector<16x16xf32> to vector<8x16xf32>
    %246 = vector.shape_cast %245 : vector<8x16xf32> to vector<8x1x16xf32>
    %247 = vector.broadcast %246 : vector<8x1x16xf32> to vector<8x8x16xf32>
    %248 = arith.mulf %247, %179 : vector<8x8x16xf32>
    %cst_53 = arith.constant dense<0.000000e+00> : vector<8x8xf32>
    %249 = vector.multi_reduction <add>, %248, %cst_53 [2] : vector<8x8x16xf32> to vector<8x8xf32>
    %250 = arith.addf %244, %249 : vector<8x8xf32>
    %cst_54 = arith.constant 0.353553385 : f32
    %251 = vector.broadcast %cst_54 : f32 to vector<8x8xf32>
    %252 = arith.mulf %250, %251 : vector<8x8xf32>
    %253 = arith.addf %252, %5 : vector<8x8xf32>
    %cst_55 = arith.constant dense<0xFF800000> : vector<8xf32>
    %254 = vector.multi_reduction <maximumf>, %253, %cst_55 [1] : vector<8x8xf32> to vector<8xf32>
    %255 = vector.shape_cast %254 : vector<8xf32> to vector<8x1xf32>
    %256 = vector.broadcast %255 : vector<8x1xf32> to vector<8x8xf32>
    %257 = arith.subf %253, %256 : vector<8x8xf32>
    %258 = math.exp %257 : vector<8x8xf32>
    %cst_56 = arith.constant dense<0.000000e+00> : vector<8xf32>
    %259 = vector.multi_reduction <add>, %258, %cst_56 [1] : vector<8x8xf32> to vector<8xf32>
    %260 = vector.shape_cast %259 : vector<8xf32> to vector<8x1xf32>
    %261 = vector.broadcast %260 : vector<8x1xf32> to vector<8x8xf32>
    %262 = arith.divf %258, %261 : vector<8x8xf32>
    %cst_57 = arith.constant dense<0.000000e+00> : vector<8x8xf32>
    %263 = tpu.matmul %262, %242, %cst_57 {dimension_numbers = #tpu.dot_dimension_numbers<[1], [0], [0], [1], [0, 0, 1, 1], [], []>} : vector<8x8xf32>, vector<8x8xf32>, vector<8x8xf32> -> vector<8x8xf32>
    %264 = vector.extract_strided_slice %17 {offsets = [8, 8], sizes = [8, 8], strides = [1, 1]} : vector<16x32xf32> to vector<8x8xf32>
    %265 = vector.extract_strided_slice %18 {offsets = [8, 8], sizes = [8, 8], strides = [1, 1]} : vector<16x32xf32> to vector<8x8xf32>
    %266 = vector.extract_strided_slice %22 {offsets = [8, 8], sizes = [8, 8], strides = [1, 1]} : vector<16x32xf32> to vector<8x8xf32>
    %cst_58 = arith.constant dense<0.000000e+00> : vector<8x8xf32>
    %267 = tpu.matmul %266, %264, %cst_58 {dimension_numbers = #tpu.dot_dimension_numbers<[1], [1], [0], [0], [0, 0, 1, 0], [], []>} : vector<8x8xf32>, vector<8x8xf32>, vector<8x8xf32> -> vector<8x8xf32>
    %268 = vector.extract_strided_slice %240 {offsets = [8, 0], sizes = [8, 16], strides = [1, 1]} : vector<16x16xf32> to vector<8x16xf32>
    %269 = vector.shape_cast %268 : vector<8x16xf32> to vector<8x1x16xf32>
    %270 = vector.broadcast %269 : vector<8x1x16xf32> to vector<8x8x16xf32>
    %271 = arith.mulf %270, %179 : vector<8x8x16xf32>
    %cst_59 = arith.constant dense<0.000000e+00> : vector<8x8xf32>
    %272 = vector.multi_reduction <add>, %271, %cst_59 [2] : vector<8x8x16xf32> to vector<8x8xf32>
    %273 = arith.addf %267, %272 : vector<8x8xf32>
    %cst_60 = arith.constant 0.353553385 : f32
    %274 = vector.broadcast %cst_60 : f32 to vector<8x8xf32>
    %275 = arith.mulf %273, %274 : vector<8x8xf32>
    %276 = arith.addf %275, %5 : vector<8x8xf32>
    %cst_61 = arith.constant dense<0xFF800000> : vector<8xf32>
    %277 = vector.multi_reduction <maximumf>, %276, %cst_61 [1] : vector<8x8xf32> to vector<8xf32>
    %278 = vector.shape_cast %277 : vector<8xf32> to vector<8x1xf32>
    %279 = vector.broadcast %278 : vector<8x1xf32> to vector<8x8xf32>
    %280 = arith.subf %276, %279 : vector<8x8xf32>
    %281 = math.exp %280 : vector<8x8xf32>
    %cst_62 = arith.constant dense<0.000000e+00> : vector<8xf32>
    %282 = vector.multi_reduction <add>, %281, %cst_62 [1] : vector<8x8xf32> to vector<8xf32>
    %283 = vector.shape_cast %282 : vector<8xf32> to vector<8x1xf32>
    %284 = vector.broadcast %283 : vector<8x1xf32> to vector<8x8xf32>
    %285 = arith.divf %281, %284 : vector<8x8xf32>
    %cst_63 = arith.constant dense<0.000000e+00> : vector<8x8xf32>
    %286 = tpu.matmul %285, %265, %cst_63 {dimension_numbers = #tpu.dot_dimension_numbers<[1], [0], [0], [1], [0, 0, 1, 1], [], []>} : vector<8x8xf32>, vector<8x8xf32>, vector<8x8xf32> -> vector<8x8xf32>
    %287 = tpu.concatenate %263, %286 in 0 : vector<8x8xf32>, vector<8x8xf32> -> vector<16x8xf32>
    %288 = vector.extract_strided_slice %20 {offsets = [0, 16], sizes = [8, 8], strides = [1, 1]} : vector<8x32xf32> to vector<8x8xf32>
    %289 = vector.extract_strided_slice %24 {offsets = [0, 16], sizes = [16, 8], strides = [1, 1]} : vector<16x32xf32> to vector<16x8xf32>
    %cst_64 = arith.constant dense<0.000000e+00> : vector<16x8xf32>
    %290 = tpu.matmul %289, %288, %cst_64 {dimension_numbers = #tpu.dot_dimension_numbers<[1], [1], [0], [0], [0, 0, 1, 0], [], []>} : vector<16x8xf32>, vector<8x8xf32>, vector<16x8xf32> -> vector<16x8xf32>
    %291 = vector.extract_strided_slice %290 {offsets = [1, 0], sizes = [15, 8], strides = [1, 1]} : vector<16x8xf32> to vector<15x8xf32>
    %292 = vector.extract_strided_slice %290 {offsets = [0, 0], sizes = [1, 8], strides = [1, 1]} : vector<16x8xf32> to vector<1x8xf32>
    %293 = tpu.concatenate %291, %292 in 0 : vector<15x8xf32>, vector<1x8xf32> -> vector<16x8xf32>
    %294 = tpu.concatenate %290, %293 in 1 : vector<16x8xf32>, vector<16x8xf32> -> vector<16x16xf32>
    %295 = vector.extract_strided_slice %17 {offsets = [0, 16], sizes = [8, 8], strides = [1, 1]} : vector<16x32xf32> to vector<8x8xf32>
    %296 = vector.extract_strided_slice %18 {offsets = [0, 16], sizes = [8, 8], strides = [1, 1]} : vector<16x32xf32> to vector<8x8xf32>
    %297 = vector.extract_strided_slice %22 {offsets = [0, 16], sizes = [8, 8], strides = [1, 1]} : vector<16x32xf32> to vector<8x8xf32>
    %cst_65 = arith.constant dense<0.000000e+00> : vector<8x8xf32>
    %298 = tpu.matmul %297, %295, %cst_65 {dimension_numbers = #tpu.dot_dimension_numbers<[1], [1], [0], [0], [0, 0, 1, 0], [], []>} : vector<8x8xf32>, vector<8x8xf32>, vector<8x8xf32> -> vector<8x8xf32>
    %299 = vector.extract_strided_slice %294 {offsets = [0, 0], sizes = [8, 16], strides = [1, 1]} : vector<16x16xf32> to vector<8x16xf32>
    %300 = vector.shape_cast %299 : vector<8x16xf32> to vector<8x1x16xf32>
    %301 = vector.broadcast %300 : vector<8x1x16xf32> to vector<8x8x16xf32>
    %302 = arith.mulf %301, %179 : vector<8x8x16xf32>
    %cst_66 = arith.constant dense<0.000000e+00> : vector<8x8xf32>
    %303 = vector.multi_reduction <add>, %302, %cst_66 [2] : vector<8x8x16xf32> to vector<8x8xf32>
    %304 = arith.addf %298, %303 : vector<8x8xf32>
    %cst_67 = arith.constant 0.353553385 : f32
    %305 = vector.broadcast %cst_67 : f32 to vector<8x8xf32>
    %306 = arith.mulf %304, %305 : vector<8x8xf32>
    %307 = arith.addf %306, %5 : vector<8x8xf32>
    %cst_68 = arith.constant dense<0xFF800000> : vector<8xf32>
    %308 = vector.multi_reduction <maximumf>, %307, %cst_68 [1] : vector<8x8xf32> to vector<8xf32>
    %309 = vector.shape_cast %308 : vector<8xf32> to vector<8x1xf32>
    %310 = vector.broadcast %309 : vector<8x1xf32> to vector<8x8xf32>
    %311 = arith.subf %307, %310 : vector<8x8xf32>
    %312 = math.exp %311 : vector<8x8xf32>
    %cst_69 = arith.constant dense<0.000000e+00> : vector<8xf32>
    %313 = vector.multi_reduction <add>, %312, %cst_69 [1] : vector<8x8xf32> to vector<8xf32>
    %314 = vector.shape_cast %313 : vector<8xf32> to vector<8x1xf32>
    %315 = vector.broadcast %314 : vector<8x1xf32> to vector<8x8xf32>
    %316 = arith.divf %312, %315 : vector<8x8xf32>
    %cst_70 = arith.constant dense<0.000000e+00> : vector<8x8xf32>
    %317 = tpu.matmul %316, %296, %cst_70 {dimension_numbers = #tpu.dot_dimension_numbers<[1], [0], [0], [1], [0, 0, 1, 1], [], []>} : vector<8x8xf32>, vector<8x8xf32>, vector<8x8xf32> -> vector<8x8xf32>
    %318 = vector.extract_strided_slice %17 {offsets = [8, 16], sizes = [8, 8], strides = [1, 1]} : vector<16x32xf32> to vector<8x8xf32>
    %319 = vector.extract_strided_slice %18 {offsets = [8, 16], sizes = [8, 8], strides = [1, 1]} : vector<16x32xf32> to vector<8x8xf32>
    %320 = vector.extract_strided_slice %22 {offsets = [8, 16], sizes = [8, 8], strides = [1, 1]} : vector<16x32xf32> to vector<8x8xf32>
    %cst_71 = arith.constant dense<0.000000e+00> : vector<8x8xf32>
    %321 = tpu.matmul %320, %318, %cst_71 {dimension_numbers = #tpu.dot_dimension_numbers<[1], [1], [0], [0], [0, 0, 1, 0], [], []>} : vector<8x8xf32>, vector<8x8xf32>, vector<8x8xf32> -> vector<8x8xf32>
    %322 = vector.extract_strided_slice %294 {offsets = [8, 0], sizes = [8, 16], strides = [1, 1]} : vector<16x16xf32> to vector<8x16xf32>
    %323 = vector.shape_cast %322 : vector<8x16xf32> to vector<8x1x16xf32>
    %324 = vector.broadcast %323 : vector<8x1x16xf32> to vector<8x8x16xf32>
    %325 = arith.mulf %324, %179 : vector<8x8x16xf32>
    %cst_72 = arith.constant dense<0.000000e+00> : vector<8x8xf32>
    %326 = vector.multi_reduction <add>, %325, %cst_72 [2] : vector<8x8x16xf32> to vector<8x8xf32>
    %327 = arith.addf %321, %326 : vector<8x8xf32>
    %cst_73 = arith.constant 0.353553385 : f32
    %328 = vector.broadcast %cst_73 : f32 to vector<8x8xf32>
    %329 = arith.mulf %327, %328 : vector<8x8xf32>
    %330 = arith.addf %329, %5 : vector<8x8xf32>
    %cst_74 = arith.constant dense<0xFF800000> : vector<8xf32>
    %331 = vector.multi_reduction <maximumf>, %330, %cst_74 [1] : vector<8x8xf32> to vector<8xf32>
    %332 = vector.shape_cast %331 : vector<8xf32> to vector<8x1xf32>
    %333 = vector.broadcast %332 : vector<8x1xf32> to vector<8x8xf32>
    %334 = arith.subf %330, %333 : vector<8x8xf32>
    %335 = math.exp %334 : vector<8x8xf32>
    %cst_75 = arith.constant dense<0.000000e+00> : vector<8xf32>
    %336 = vector.multi_reduction <add>, %335, %cst_75 [1] : vector<8x8xf32> to vector<8xf32>
    %337 = vector.shape_cast %336 : vector<8xf32> to vector<8x1xf32>
    %338 = vector.broadcast %337 : vector<8x1xf32> to vector<8x8xf32>
    %339 = arith.divf %335, %338 : vector<8x8xf32>
    %cst_76 = arith.constant dense<0.000000e+00> : vector<8x8xf32>
    %340 = tpu.matmul %339, %319, %cst_76 {dimension_numbers = #tpu.dot_dimension_numbers<[1], [0], [0], [1], [0, 0, 1, 1], [], []>} : vector<8x8xf32>, vector<8x8xf32>, vector<8x8xf32> -> vector<8x8xf32>
    %341 = tpu.concatenate %317, %340 in 0 : vector<8x8xf32>, vector<8x8xf32> -> vector<16x8xf32>
    %342 = vector.extract_strided_slice %20 {offsets = [0, 24], sizes = [8, 8], strides = [1, 1]} : vector<8x32xf32> to vector<8x8xf32>
    %343 = vector.extract_strided_slice %24 {offsets = [0, 24], sizes = [16, 8], strides = [1, 1]} : vector<16x32xf32> to vector<16x8xf32>
    %cst_77 = arith.constant dense<0.000000e+00> : vector<16x8xf32>
    %344 = tpu.matmul %343, %342, %cst_77 {dimension_numbers = #tpu.dot_dimension_numbers<[1], [1], [0], [0], [0, 0, 1, 0], [], []>} : vector<16x8xf32>, vector<8x8xf32>, vector<16x8xf32> -> vector<16x8xf32>
    %345 = vector.extract_strided_slice %344 {offsets = [1, 0], sizes = [15, 8], strides = [1, 1]} : vector<16x8xf32> to vector<15x8xf32>
    %346 = vector.extract_strided_slice %344 {offsets = [0, 0], sizes = [1, 8], strides = [1, 1]} : vector<16x8xf32> to vector<1x8xf32>
    %347 = tpu.concatenate %345, %346 in 0 : vector<15x8xf32>, vector<1x8xf32> -> vector<16x8xf32>
    %348 = tpu.concatenate %344, %347 in 1 : vector<16x8xf32>, vector<16x8xf32> -> vector<16x16xf32>
    %349 = vector.extract_strided_slice %17 {offsets = [0, 24], sizes = [8, 8], strides = [1, 1]} : vector<16x32xf32> to vector<8x8xf32>
    %350 = vector.extract_strided_slice %18 {offsets = [0, 24], sizes = [8, 8], strides = [1, 1]} : vector<16x32xf32> to vector<8x8xf32>
    %351 = vector.extract_strided_slice %22 {offsets = [0, 24], sizes = [8, 8], strides = [1, 1]} : vector<16x32xf32> to vector<8x8xf32>
    %cst_78 = arith.constant dense<0.000000e+00> : vector<8x8xf32>
    %352 = tpu.matmul %351, %349, %cst_78 {dimension_numbers = #tpu.dot_dimension_numbers<[1], [1], [0], [0], [0, 0, 1, 0], [], []>} : vector<8x8xf32>, vector<8x8xf32>, vector<8x8xf32> -> vector<8x8xf32>
    %353 = vector.extract_strided_slice %348 {offsets = [0, 0], sizes = [8, 16], strides = [1, 1]} : vector<16x16xf32> to vector<8x16xf32>
    %354 = vector.shape_cast %353 : vector<8x16xf32> to vector<8x1x16xf32>
    %355 = vector.broadcast %354 : vector<8x1x16xf32> to vector<8x8x16xf32>
    %356 = arith.mulf %355, %179 : vector<8x8x16xf32>
    %cst_79 = arith.constant dense<0.000000e+00> : vector<8x8xf32>
    %357 = vector.multi_reduction <add>, %356, %cst_79 [2] : vector<8x8x16xf32> to vector<8x8xf32>
    %358 = arith.addf %352, %357 : vector<8x8xf32>
    %cst_80 = arith.constant 0.353553385 : f32
    %359 = vector.broadcast %cst_80 : f32 to vector<8x8xf32>
    %360 = arith.mulf %358, %359 : vector<8x8xf32>
    %361 = arith.addf %360, %5 : vector<8x8xf32>
    %cst_81 = arith.constant dense<0xFF800000> : vector<8xf32>
    %362 = vector.multi_reduction <maximumf>, %361, %cst_81 [1] : vector<8x8xf32> to vector<8xf32>
    %363 = vector.shape_cast %362 : vector<8xf32> to vector<8x1xf32>
    %364 = vector.broadcast %363 : vector<8x1xf32> to vector<8x8xf32>
    %365 = arith.subf %361, %364 : vector<8x8xf32>
    %366 = math.exp %365 : vector<8x8xf32>
    %cst_82 = arith.constant dense<0.000000e+00> : vector<8xf32>
    %367 = vector.multi_reduction <add>, %366, %cst_82 [1] : vector<8x8xf32> to vector<8xf32>
    %368 = vector.shape_cast %367 : vector<8xf32> to vector<8x1xf32>
    %369 = vector.broadcast %368 : vector<8x1xf32> to vector<8x8xf32>
    %370 = arith.divf %366, %369 : vector<8x8xf32>
    %cst_83 = arith.constant dense<0.000000e+00> : vector<8x8xf32>
    %371 = tpu.matmul %370, %350, %cst_83 {dimension_numbers = #tpu.dot_dimension_numbers<[1], [0], [0], [1], [0, 0, 1, 1], [], []>} : vector<8x8xf32>, vector<8x8xf32>, vector<8x8xf32> -> vector<8x8xf32>
    %372 = vector.extract_strided_slice %17 {offsets = [8, 24], sizes = [8, 8], strides = [1, 1]} : vector<16x32xf32> to vector<8x8xf32>
    %373 = vector.extract_strided_slice %18 {offsets = [8, 24], sizes = [8, 8], strides = [1, 1]} : vector<16x32xf32> to vector<8x8xf32>
    %374 = vector.extract_strided_slice %22 {offsets = [8, 24], sizes = [8, 8], strides = [1, 1]} : vector<16x32xf32> to vector<8x8xf32>
    %cst_84 = arith.constant dense<0.000000e+00> : vector<8x8xf32>
    %375 = tpu.matmul %374, %372, %cst_84 {dimension_numbers = #tpu.dot_dimension_numbers<[1], [1], [0], [0], [0, 0, 1, 0], [], []>} : vector<8x8xf32>, vector<8x8xf32>, vector<8x8xf32> -> vector<8x8xf32>
    %376 = vector.extract_strided_slice %348 {offsets = [8, 0], sizes = [8, 16], strides = [1, 1]} : vector<16x16xf32> to vector<8x16xf32>
    %377 = vector.shape_cast %376 : vector<8x16xf32> to vector<8x1x16xf32>
    %378 = vector.broadcast %377 : vector<8x1x16xf32> to vector<8x8x16xf32>
    %379 = arith.mulf %378, %179 : vector<8x8x16xf32>
    %cst_85 = arith.constant dense<0.000000e+00> : vector<8x8xf32>
    %380 = vector.multi_reduction <add>, %379, %cst_85 [2] : vector<8x8x16xf32> to vector<8x8xf32>
    %381 = arith.addf %375, %380 : vector<8x8xf32>
    %cst_86 = arith.constant 0.353553385 : f32
    %382 = vector.broadcast %cst_86 : f32 to vector<8x8xf32>
    %383 = arith.mulf %381, %382 : vector<8x8xf32>
    %384 = arith.addf %383, %5 : vector<8x8xf32>
    %cst_87 = arith.constant dense<0xFF800000> : vector<8xf32>
    %385 = vector.multi_reduction <maximumf>, %384, %cst_87 [1] : vector<8x8xf32> to vector<8xf32>
    %386 = vector.shape_cast %385 : vector<8xf32> to vector<8x1xf32>
    %387 = vector.broadcast %386 : vector<8x1xf32> to vector<8x8xf32>
    %388 = arith.subf %384, %387 : vector<8x8xf32>
    %389 = math.exp %388 : vector<8x8xf32>
    %cst_88 = arith.constant dense<0.000000e+00> : vector<8xf32>
    %390 = vector.multi_reduction <add>, %389, %cst_88 [1] : vector<8x8xf32> to vector<8xf32>
    %391 = vector.shape_cast %390 : vector<8xf32> to vector<8x1xf32>
    %392 = vector.broadcast %391 : vector<8x1xf32> to vector<8x8xf32>
    %393 = arith.divf %389, %392 : vector<8x8xf32>
    %cst_89 = arith.constant dense<0.000000e+00> : vector<8x8xf32>
    %394 = tpu.matmul %393, %373, %cst_89 {dimension_numbers = #tpu.dot_dimension_numbers<[1], [0], [0], [1], [0, 0, 1, 1], [], []>} : vector<8x8xf32>, vector<8x8xf32>, vector<8x8xf32> -> vector<8x8xf32>
    %395 = tpu.concatenate %371, %394 in 0 : vector<8x8xf32>, vector<8x8xf32> -> vector<16x8xf32>
    %396 = tpu.concatenate %233, %287, %341, %395 in 1 : vector<16x8xf32>, vector<16x8xf32>, vector<16x8xf32>, vector<16x8xf32> -> vector<16x32xf32>
    %397 = vector.extract_strided_slice %3 {offsets = [0, 0], sizes = [32, 32], strides = [1, 1]} : vector<32x96xf32> to vector<32x32xf32>
    %cst_90 = arith.constant dense<0.000000e+00> : vector<16x32xf32>
    %398 = tpu.matmul %396, %397, %cst_90 {dimension_numbers = #tpu.dot_dimension_numbers<[1], [0], [0], [1], [0, 0, 1, 1], [], []>} : vector<16x32xf32>, vector<32x32xf32>, vector<16x32xf32> -> vector<16x32xf32>
    %399 = arith.addf %0, %398 : vector<16x32xf32>
    %cst_91 = arith.constant dense<0.000000e+00> : vector<16xf32>
    %400 = vector.multi_reduction <add>, %399, %cst_91 [1] : vector<16x32xf32> to vector<16xf32>
    %401 = vector.shape_cast %400 : vector<16xf32> to vector<16x1xf32>
    %cst_92 = arith.constant 3.200000e+01 : f32
    %402 = vector.broadcast %cst_92 : f32 to vector<16x1xf32>
    %403 = arith.divf %401, %402 : vector<16x1xf32>
    %404 = vector.broadcast %403 : vector<16x1xf32> to vector<16x32xf32>
    %405 = arith.subf %399, %404 : vector<16x32xf32>
    %406 = arith.mulf %405, %405 : vector<16x32xf32>
    %cst_93 = arith.constant dense<0.000000e+00> : vector<16xf32>
    %407 = vector.multi_reduction <add>, %406, %cst_93 [1] : vector<16x32xf32> to vector<16xf32>
    %408 = vector.shape_cast %407 : vector<16xf32> to vector<16x1xf32>
    %cst_94 = arith.constant 3.200000e+01 : f32
    %409 = vector.broadcast %cst_94 : f32 to vector<16x1xf32>
    %410 = arith.divf %408, %409 : vector<16x1xf32>
    %411 = vector.broadcast %403 : vector<16x1xf32> to vector<16x32xf32>
    %412 = arith.subf %399, %411 : vector<16x32xf32>
    %cst_95 = arith.constant 9.99999974E-6 : f32
    %413 = vector.broadcast %cst_95 : f32 to vector<16x1xf32>
    %414 = arith.addf %410, %413 : vector<16x1xf32>
    %415 = math.rsqrt %414 : vector<16x1xf32>
    %416 = vector.broadcast %415 : vector<16x1xf32> to vector<16x32xf32>
    %417 = arith.mulf %412, %416 : vector<16x32xf32>
    %418 = vector.broadcast %9 : vector<1x32xf32> to vector<16x32xf32>
    %419 = arith.mulf %417, %418 : vector<16x32xf32>
    %420 = vector.broadcast %10 : vector<1x32xf32> to vector<16x32xf32>
    %421 = arith.addf %419, %420 : vector<16x32xf32>
    %422 = vector.extract_strided_slice %3 {offsets = [0, 32], sizes = [32, 64], strides = [1, 1]} : vector<32x96xf32> to vector<32x64xf32>
    %cst_96 = arith.constant dense<0.000000e+00> : vector<16x64xf32>
    %423 = tpu.matmul %421, %422, %cst_96 {dimension_numbers = #tpu.dot_dimension_numbers<[1], [0], [0], [1], [0, 0, 1, 1], [], []>} : vector<16x32xf32>, vector<32x64xf32>, vector<16x64xf32> -> vector<16x64xf32>
    %424 = vector.broadcast %11 : vector<1x64xf32> to vector<16x64xf32>
    %425 = arith.addf %423, %424 : vector<16x64xf32>
    %cst_97 = arith.constant 0.000000e+00 : f32
    %426 = vector.broadcast %cst_97 : f32 to vector<16x64xf32>
    %427 = arith.maximumf %425, %426 : vector<16x64xf32>
    %cst_98 = arith.constant dense<0.000000e+00> : vector<16x32xf32>
    %428 = tpu.matmul %427, %4, %cst_98 {dimension_numbers = #tpu.dot_dimension_numbers<[1], [0], [0], [1], [0, 0, 1, 1], [], []>} : vector<16x64xf32>, vector<64x32xf32>, vector<16x32xf32> -> vector<16x32xf32>
    %429 = vector.broadcast %12 : vector<1x32xf32> to vector<16x32xf32>
    %430 = arith.addf %428, %429 : vector<16x32xf32>
    %431 = arith.addf %421, %430 : vector<16x32xf32>
    %cst_99 = arith.constant dense<0.000000e+00> : vector<16xf32>
    %432 = vector.multi_reduction <add>, %431, %cst_99 [1] : vector<16x32xf32> to vector<16xf32>
    %433 = vector.shape_cast %432 : vector<16xf32> to vector<16x1xf32>
    %cst_100 = arith.constant 3.200000e+01 : f32
    %434 = vector.broadcast %cst_100 : f32 to vector<16x1xf32>
    %435 = arith.divf %433, %434 : vector<16x1xf32>
    %436 = vector.broadcast %435 : vector<16x1xf32> to vector<16x32xf32>
    %437 = arith.subf %431, %436 : vector<16x32xf32>
    %438 = arith.mulf %437, %437 : vector<16x32xf32>
    %cst_101 = arith.constant dense<0.000000e+00> : vector<16xf32>
    %439 = vector.multi_reduction <add>, %438, %cst_101 [1] : vector<16x32xf32> to vector<16xf32>
    %440 = vector.shape_cast %439 : vector<16xf32> to vector<16x1xf32>
    %cst_102 = arith.constant 3.200000e+01 : f32
    %441 = vector.broadcast %cst_102 : f32 to vector<16x1xf32>
    %442 = arith.divf %440, %441 : vector<16x1xf32>
    %443 = vector.broadcast %435 : vector<16x1xf32> to vector<16x32xf32>
    %444 = arith.subf %431, %443 : vector<16x32xf32>
    %cst_103 = arith.constant 9.99999974E-6 : f32
    %445 = vector.broadcast %cst_103 : f32 to vector<16x1xf32>
    %446 = arith.addf %442, %445 : vector<16x1xf32>
    %447 = math.rsqrt %446 : vector<16x1xf32>
    %448 = vector.broadcast %447 : vector<16x1xf32> to vector<16x32xf32>
    %449 = arith.mulf %444, %448 : vector<16x32xf32>
    %450 = vector.broadcast %13 : vector<1x32xf32> to vector<16x32xf32>
    %451 = arith.mulf %449, %450 : vector<16x32xf32>
    %452 = vector.broadcast %14 : vector<1x32xf32> to vector<16x32xf32>
    %453 = arith.addf %451, %452 : vector<16x32xf32>
    %c0_104 = arith.constant 0 : index
    %c0_105 = arith.constant 0 : index
    %454 = vector.load %arg7[%c0_104, %c0_105] : memref<16x32xf32, #tpu.memory_space<vmem>>, vector<16x32xf32>
    tpu.vector_store %arg7[%c0_104, %c0_105], %453 {strides = array<i32>} : memref<16x32xf32, #tpu.memory_space<vmem>>, vector<16x32xf32>,
    return
  }
}

</mosaic_0001>

<bundles_post_ra>
// kernel: transformer_block_forward.1
= control target key start
LH: loop header
LB: loop body
LE: loop exit
PB: predicated region body
PF: predicated region fallthrough
CT: control target
= control target key end

     0   :  { %v138_v3 = vlaneseq  ;;  %v4183_v4 = vmov 0.0|0.0   ;;  %vm5245_vm0 = vmmov 0   ;;  %v4185_v7 = vmov 0.0   ;;  %s5235_s0 = inlined_call_operand.vmem [shape: f32[16,32], index: 0, kind: input, shape index: {}]   ;;  %s5236_s1 = inlined_call_operand.vmem [shape: f32[8,32], index: 1, kind: input, shape index: {}]   ;;  %s5237_s2 = inlined_call_operand.vmem [shape: f32[32,128], index: 2, kind: input, shape index: {}]   ;;  %s5238_s3 = inlined_call_operand.vmem [shape: f32[32,96], index: 3, kind: input, shape index: {}]   ;;  %s5239_s4 = inlined_call_operand.vmem [shape: f32[64,32], index: 4, kind: input, shape index: {}]   ;;  %s5240_s5 = inlined_call_operand.vmem [shape: f32[8,64], index: 5, kind: input, shape index: {}]   ;;  %s5241_s6 = inlined_call_operand.vmem [shape: f32[8,8], index: 6, kind: input, shape index: {}]   ;;  %s5242_s7 = inlined_call_operand.hbm [shape: f32[16,32], index: 7, kind: output, shape index: {}]  }
   0x1   :  { %v30_v0 = vld [vmem:[%s5237_s2] sm:$0xff]  ;;  %v31_v1 = vld [vmem:[%s5237_s2 + $0x8] sm:$0xff]  ;;  %v32_v2 = vld [vmem:[%s5237_s2 + $0x10] sm:$0xff]  ;;  %4046 = vmatprep.subr.bf16.mxu0 %v4183_v4  ;;  %3896 = vmatprep.mubr.msk.f32.mxu0 %vm5245_vm0, %v4185_v7 }
   0x2   :  { %v4047_v5 = vpack.c.bf16 %v31_v1, %v30_v0  ;;  %v33_v6 = vld [vmem:[%s5237_s2 + $0x18] sm:$0xff]  ;;  %v4259_v8 = vshrl.u32 %v138_v3, 7  ;;  %v47_v10 = vld [vmem:[%s5240_s5] sm:$0xff] }
   0x3   :  { %v4050_v9 = vpack.c.bf16 %v33_v6, %v32_v2 }
   0x4   :  { %4048 = vmatpush3.bf16.msra.mxu0 %v4047_v5 }
   0x5   :  { %12 = vsyncpa [#allocation3], 0  ;;  %4049 = vmatprep.subr.bf16.mxu0 %v4183_v4  ;;  %v150_v11 = vsub.s32 1, %v4259_v8  ;;  %v27_v13 = vld [vmem:[%s5235_s0] sm:$0xff]  ;;  %vm5243_vm1 = vcmask 261120   ;;  %s4186_s12 = smov 64  }
   0x6   :  { %v28_v14 = vld [vmem:[%s5235_s0 + $0x8] sm:$0xff]  ;;  %v29_v15 = vld [vmem:[%s5236_s1] sm:$0xff]  ;;  %v4295_v21 = vsub.s32 0, %v4259_v8  ;;  %s4187_s1 = smov 32   ;;  %vm5247_vm2 = vcmask 64512   ;;  %vm5244_vm3 = vcmask 1046528  }
   0x7   :  { %v151_v12 = vrot.slane %v47_v10, %v150_v11  ;;  %s4188_s17 = smov 8   ;;  %v4337_v39 = vand.u32 127, %v138_v3  ;;  %v162_v40 = vadd.s32 7, %v4259_v8  ;;  %v166_v41 = vadd.s32 6, %v4259_v8  ;;  %s4190_s20 = smov 96  }
   0x8   :  { %4051 = vmatpush3.bf16.msra.mxu0 %v4050_v9  ;;  %v141_v26 = vrot.slane %v47_v10, %v4295_v21  ;;  %v176_v42 = vadd.s32 5, %v4259_v8  ;;  %v185_v45 = vadd.s32 4, %v4259_v8  ;;  %v4189_v46 = vmov 1966171168   ;;  %s4191_s21 = smov 24   ;;  %s4192_s22 = smov 56  }
   0x9   :  { %153 = vrot.lane.b32.xlu0 %v151_v12, %s4186_s12  ;;  %3925 = vmatprep.subr.mxu0 %v4185_v7  ;;  %vm163_vm4 = vcmp.eq.s32.totalorder %v4337_v39, %v162_v40  ;;  %vm164_vm5 = vcmp.lt.s32.totalorder %v4337_v39, 8  ;;  %vm167_vm6 = vcmp.eq.s32.totalorder %v4337_v39, %v166_v41  ;;  %vm5249_vm7 = vcmp.ge.s32.totalorder %v4337_v39, 8  ;;  %s4193_s23 = smov 120   ;;  %s4194_s24 = smov 16  }
   0xa   :  { %vm4348_vm8 = vmand %vm163_vm4, %vm164_vm5  ;;  %v349_v47 = vunpack.c.l.s4 %v4189_v46  ;;  %vm177_vm10 = vcmp.eq.s32.totalorder %v4337_v39, %v176_v42  ;;  %v194_v48 = vadd.s32 3, %v4259_v8  ;;  %vm170_vm13 = vcmp.le.s32.totalorder %v4259_v8, 6  ;;  %s4195_s25 = smov 48   ;;  %s4196_s26 = smov 88  }
   0xb   :  { %3897 = vmatmul.mubr.msk.f32.vlgmr.msra.gmra.mrb[0].mxu0 %vm5243_vm1, %v27_v13  ;;  %vm4354_vm9 = vmand %vm167_vm6, %vm5249_vm7  ;;  %vm186_vm15 = vcmp.eq.s32.totalorder %v4337_v39, %v185_v45  ;;  %v212_v54 = vadd.s32 1, %v4259_v8  ;;  %v203_v56 = vadd.s32 2, %v4259_v8  ;;  %v229_v1 = vadd.s32 4294967295, %v4259_v8  ;;  %s4197_s27 = smov 112   ;;  %s4198_s28 = smov 40  }
   0xc   :  { %3899 = vmatprep.mubr.msk.f32.mxu0 %vm5245_vm0, %v4185_v7  ;;  %vm171_vm11 = vmor %vm4348_vm8, %vm4354_vm9  ;;  %v350_v51 = vunpack.c.0.s8 %v349_v47  ;;  %v4626_v47 = vld [vmem:[%s5241_s6] sm:$0xff]  ;;  %s4199_s8 = smov 80   ;;  %s4200_s9 = smov 104  }
   0xd   :  { %vm4367_vm12 = vmand %vm167_vm6, %vm164_vm5  ;;  %vm195_vm6 = vcmp.eq.s32.totalorder %v4337_v39, %v194_v48 }
   0xe   :  { %vm4376_vm14 = vmand %vm177_vm10, %vm5249_vm7  ;;  %v4409_v57 = vsub.s32 %v350_v51, %v4259_v8 }
   0xf   :  { %3900 = vmatmul.mubr.msk.f32.gmra.mrb[2].mxu0 %vm5243_vm1, %v28_v14  ;;  %vm4385_vm4 = vmand %vm186_vm15, %vm164_vm5 }
  0x10   :  { %3902 = vmatprep.mubr.msk.f32.mxu0 %vm5245_vm0, %v4185_v7  ;;  %vm4394_vm8 = vmand %vm195_vm6, %vm5249_vm7 }
  0x11   :  { %vm4399_vm9 = vmand %vm171_vm11, %vm170_vm13  ;;  %vm204_vm11 = vcmp.eq.s32.totalorder %v4337_v39, %v203_v56 }
  0x12   :  { %vm4421_vm13 = vmand %vm177_vm10, %vm164_vm5  ;;  %v4471_v12 = vsel %vm4399_vm9, 1.0, %v4185_v7  ;;  %vm444_vm9 = vcmask 130048  }
  0x13   :  { %3903 = vmatmul.mubr.msk.f32.gmra.mrb[4].mxu0 %vm5243_vm1, %v29_v15  ;;  %vm4438_vm10 = vmand %vm204_vm11, %vm164_vm5 }
  0x14   :  { %3927 = vmatprep.mubr.msk.f32.mxu0 %vm5245_vm0, %v4185_v7  ;;  %vm4464_vm1 = vmand %vm204_vm11, %vm5249_vm7 }
  0x7b   :  { %v154_v16 = vpop.permute.xlu0 %153 }
  0xde   :  { %v4285_v17 = vpop.f32.mrb[0].mxu0 }
  0xdf   :  { %v3898_v18 = vpop.f32.mrb[1].mxu0  ;;  %v4288_v19 = vadd.f32 %v154_v16, %v4285_v17 }
  0xe1   :  { %239 = vrot.lane.b32.xlu1 %v4288_v19, %s4186_s12 }
  0xe2   :  { %v4292_v20 = vpop.f32.mrb[2].mxu0 }
  0xe3   :  { %v3901_v22 = vpop.f32.mrb[3].mxu0  ;;  %v4298_v23 = vadd.f32 %v154_v16, %v4292_v20 }
  0xe5   :  { %241 = vrot.lane.b32.xlu1 %v4298_v23, %s4186_s12 }
  0xe6   :  { %v4302_v24 = vpop.f32.mrb[4].mxu0 }
  0xe7   :  { %244 = vrot.lane.b32.xlu0 %v4302_v24, %s4187_s1  ;;  %v3904_v25 = vpop.f32.mrb[5].mxu0 }
  0xeb   :  { %143 = vrot.lane.b32.xlu0 %v141_v26, %s4186_s12 }
 0x153   :  { %v240_v27 = vpop.permute.xlu1 %239 }
 0x154   :  { %3907 = vmatprep.mubr.msk.f32.mxu1 %vm5247_vm2, %v240_v27 }
 0x157   :  { %v242_v29 = vpop.permute.xlu1 %241 }
 0x159   :  { %v245_v28 = vpop.permute.xlu0 %244 }
 0x15a   :  { %3905 = vmatprep.subr.msk.mxu1 %vm5247_vm2, %v245_v28 }
 0x15b   :  { %3906 = vmatpush3.xpose.msk.msra.mxu1 %vm5247_vm2, %v245_v28 }
 0x15c   :  { %3910 = vmatprep.subr.mxu1 %v4185_v7 }
 0x15d   :  { %v4311_v30 = vpop.permute.xlu0 %143 }
 0x15e   :  { %v4315_v31 = vadd.f32 %v4311_v30, %v4285_v17  ;;  %3908 = vmatmul.mubr.msk.f32.vlgmr.msra.gmra.mrb[0].mxu1 %vm5247_vm2, %v242_v29 }
 0x15f   :  { %3911 = vmatpush3.xpose.msk.msra.mxu1 %vm5247_vm2, %v4285_v17  ;;  %3912 = vmatprep.mubr.msk.f32.mxu1 %vm5245_vm0, %v4185_v7 }
 0x160   :  { %470 = vrot.lane.b32.xlu1 %v4315_v31, %s4186_s12  ;;  %3915 = vmatprep.subr.mxu1 %v4185_v7 }
 0x1d2   :  { %v471_v32 = vpop.permute.xlu1 %470 }
 0x1d3   :  { %3913 = vmatmul.mubr.msk.f32.vlgmr.msra.gmra.mrb[2].mxu1 %vm5247_vm2, %v471_v32 }
 0x1d4   :  { %3917 = vmatprep.mubr.msk.f32.mxu1 %vm5245_vm0, %v4185_v7  ;;  %vm4430_vm0 = vmand %vm186_vm15, %vm5249_vm7 }
 0x231   :  { %v4328_v33 = vpop.f32.mrb[0].mxu1 }
 0x232   :  { %v332_v34 = vrot.slane %v4328_v33, 1  ;;  %v319_v35 = vpop.f32.mrb[1].mxu1 }
 0x233   :  { %v331_v36 = vrot.slane %v319_v35, 1 }
 0x235   :  { %v333_v37 = vsel %vm5244_vm3, %v331_v36, %v332_v34  ;;  %v4333_v38 = vsel %vm5244_vm3, %v332_v34, %v331_v36  ;;  %vm5248_vm3 = vcmp.eq.s32.totalorder %v4337_v39, %v212_v54 }
 0x236   :  { %338 = vrot.lane.b32.xlu0 %v333_v37, %s4188_s17  ;;  %vm4448_vm15 = vmand %vm5248_vm3, %vm5249_vm7  ;;  %vm5282_vm3 = vcmp.ge.s32.totalorder %v4337_v39, 8 }
 0x237   :  { %vm5277_vm7 = vmor %vm4367_vm12, %vm4376_vm14 }
 0x238   :  { %v4490_v18 = vsel %vm5277_vm7, 1.0, %v4185_v7  ;;  %vm5280_vm12 = vmor %vm4385_vm4, %vm4394_vm8  ;;  %vm5290_vm8 = vcmp.ge.s32.totalorder %v4337_v39, 8 }
 0x239   :  { %v4517_v32 = vsel %vm5280_vm12, 1.0, %v4185_v7  ;;  %vm5281_vm14 = vmor %vm4421_vm13, %vm4430_vm0  ;;  %vm5286_vm0 = vcmp.eq.s32.totalorder %v4337_v39, %v212_v54  ;;  %vm520_vm12 = vcmask 1045509  }
 0x23a   :  { %v4525_v34 = vsel %vm5281_vm14, 1.0, %v4185_v7  ;;  %vm4543_vm4 = vmand %vm5286_vm0, %vm164_vm5  ;;  %vm522_vm14 = vcmask 1046534   ;;  %vm524_vm0 = vcmask 1047559  }
 0x2a6   :  { %v4411_v58 = vpop.f32.mrb[2].mxu1 }
 0x2a7   :  { %v3914_v59 = vpop.f32.mrb[3].mxu1 }
 0x2a8   :  { %v339_v61 = vpop.permute.xlu0 %338 }
 0x2a9   :  { %v344_v63 = vsel %vm5247_vm2, %v319_v35, %v339_v61  ;;  %vm4456_vm2 = vmand %vm195_vm6, %vm164_vm5  ;;  %vm5250_vm6 = vcmp.eq.s32.totalorder %v4337_v39, %v4259_v8 }
 0x2aa   :  { %v347_v2 = vcombine.high %v344_v63, %v344_v63  ;;  %v354_v3 = vrot.slane %v344_v63, %v4409_v57  ;;  %vm4507_vm7 = vmand %vm5250_vm6, %vm164_vm5  ;;  %vm5283_vm6 = vcmp.eq.s32.totalorder %v4337_v39, %v229_v1  ;;  %vm5291_vm5 = vcmp.eq.s32.totalorder %v4337_v39, %v4259_v8 }
 0x2ab   :  { %vm4532_vm11 = vmand %vm5283_vm6, %vm5282_vm3 }
 0x2ac   :  { %v361_v6 = vrot.slane %v347_v2, %v4409_v57  ;;  %v362_v9 = vcombine.high %v354_v3, %v354_v3  ;;  %v370_v10 = vrot.slane %v354_v3, %v4409_v57  ;;  %vm5289_vm3 = vmor %vm4438_vm10, %vm4448_vm15 }
 0x2ad   :  { %v4553_v43 = vsel %vm5289_vm3, 1.0, %v4185_v7  ;;  %vm4562_vm13 = vmand %vm5291_vm5, %vm5290_vm8 }
 0x2ae   :  { %v363_v13 = vcombine.high %v361_v6, %v361_v6  ;;  %v399_v14 = vrot.slane %v370_v10, %v4295_v21  ;;  %v384_v15 = vrot.slane %v362_v9, %v4409_v57  ;;  %v392_v16 = vcombine.high %v370_v10, %v370_v10  ;;  %vm233_vm10 = vmor %vm4507_vm7, %vm4532_vm11 }
 0x2af   :  { %v377_v22 = vrot.slane %v361_v6, %v4409_v57  ;;  %vm5294_vm15 = vmor %vm4456_vm2, %vm4464_vm1  ;;  %v4589_v56 = vsel %vm233_vm10, 1.0, %v4185_v7  ;;  %v4605_v6 = vsub.s32 %v4337_v39, %v4259_v8  ;;  %vm512_vm1 = vcmask 1041409  }
 0x2b0   :  { %v436_v25 = vmul.f32 %v4471_v12, %v399_v14  ;;  %v403_v26 = vrot.slane %v384_v15, %v4295_v21  ;;  %v394_v27 = vcombine.high %v384_v15, %v384_v15  ;;  %v407_v28 = vrot.slane %v392_v16, %v4295_v21  ;;  %vm224_vm6 = vmor %vm4543_vm4, %vm4562_vm13 }
 0x2b1   :  { %v391_v35 = vrot.slane %v363_v13, %v4409_v57  ;;  %v415_v45 = vrot.slane %v377_v22, %v4295_v21  ;;  %v393_v51 = vcombine.high %v377_v22, %v377_v22  ;;  %v4579_v52 = vsel %vm5294_vm15, 1.0, %v4185_v7 }
 0x2b2   :  { %v445_v37 = vsel %vm444_vm9, %v436_v25, 0.0  ;;  %v437_v40 = vmul.f32 %v4490_v18, %v403_v26  ;;  %v411_v41 = vrot.slane %v394_v27, %v4295_v21  ;;  %v438_v50 = vmul.f32 %v4525_v34, %v407_v28 }
 0x2b3   :  { %446 = vadd.xlane.f32.xlu1 %v445_v37  ;;  %v419_v44 = vrot.slane %v391_v35, %v4295_v21  ;;  %v395_v46 = vcombine.high %v391_v35, %v391_v35  ;;  %v440_v60 = vmul.f32 %v4579_v52, %v415_v45  ;;  %v423_v61 = vrot.slane %v393_v51, %v4295_v21 }
 0x2b4   :  { %v448_v48 = vsel %vm444_vm9, %v437_v40, 0.0  ;;  %v439_v49 = vmul.f32 %v4517_v32, %v411_v41  ;;  %v451_v59 = vsel %vm444_vm9, %v438_v50, 0.0  ;;  %v4595_v62 = vsel %vm224_vm6, 1.0, %v4185_v7 }
 0x2b5   :  { %449 = vadd.xlane.f32.xlu0 %v448_v48  ;;  %v441_v54 = vmul.f32 %v4553_v43, %v419_v44  ;;  %v427_v55 = vrot.slane %v395_v46, %v4295_v21  ;;  %v457_v1 = vsel %vm444_vm9, %v440_v60, 0.0  ;;  %v442_v2 = vmul.f32 %v4595_v62, %v423_v61 }
 0x2b6   :  { %v454_v53 = vsel %vm444_vm9, %v439_v49, 0.0  ;;  %vm514_vm2 = vcmask 1042434   ;;  %vm516_vm11 = vcmask 1043459   ;;  %vm518_vm7 = vcmask 1044484  }
 0x2b7   :  { %455 = vadd.xlane.f32.xlu1 %v454_v53  ;;  %v460_v63 = vsel %vm444_vm9, %v441_v54, 0.0  ;;  %v443_v0 = vmul.f32 %v4589_v56, %v427_v55  ;;  %v463_v4 = vsel %vm444_vm9, %v442_v2, 0.0  ;;  %vm5295_vm4 = vcmask 64512  }
 0x2b8   :  { %vm5296_vm3 = vmmov %vm5295_vm4  ;;  %v4636_v60 = vadd.f32 %v4311_v30, %v4292_v20  ;;  %vm5300_vm10 = vmmov 0  }
 0x2b9   :  { %452 = vadd.xlane.f32.xlu0 %v451_v59  ;;  %v466_v3 = vsel %vm444_vm9, %v443_v0, 0.0  ;;  %vm5297_vm8 = vmmov %vm5296_vm3 }
 0x2ba   :  { %vm5298_vm5 = vmmov %vm5296_vm3 }
 0x2bb   :  { %461 = vadd.xlane.f32.xlu1 %v460_v63  ;;  %vm5299_vm13 = vmmov %vm5296_vm3 }
 0x2bc   :  { %vm5301_vm15 = vmmov %vm5296_vm3 }
 0x2bd   :  { %458 = vadd.xlane.f32.xlu0 %v457_v1  ;;  %vm5302_vm6 = vmmov %vm5296_vm3 }
 0x2bf   :  { %467 = vadd.xlane.f32.xlu1 %v466_v3 }
 0x2c1   :  { %464 = vadd.xlane.f32.xlu0 %v463_v4 }
 0x340   :  { %v447_v5 = vpop.xlane.xlu1 %446 }
 0x341   :  { %v483_v13 = vrot.slane %v447_v5, %v4605_v6 }
 0x342   :  { %v450_v9 = vpop.xlane.xlu0 %449 }
 0x343   :  { %v487_v10 = vrot.slane %v450_v9, %v4605_v6 }
 0x344   :  { %v456_v11 = vpop.xlane.xlu1 %455 }
 0x345   :  { %v513_v16 = vsel %vm512_vm1, %v487_v10, %v483_v13  ;;  %v495_v39 = vrot.slane %v456_v11, %v4605_v6 }
 0x346   :  { %v453_v14 = vpop.xlane.xlu0 %452 }
 0x347   :  { %v491_v15 = vrot.slane %v453_v14, %v4605_v6 }
 0x348   :  { %v462_v22 = vpop.xlane.xlu1 %461 }
 0x349   :  { %v515_v25 = vsel %vm514_vm2, %v491_v15, %v513_v16  ;;  %v503_v36 = vrot.slane %v462_v22, %v4605_v6 }
 0x34a   :  { %v459_v26 = vpop.xlane.xlu0 %458  ;;  %v517_v28 = vsel %vm516_vm11, %v495_v39, %v515_v25 }
 0x34b   :  { %v499_v27 = vrot.slane %v459_v26, %v4605_v6 }
 0x34c   :  { %v468_v35 = vpop.xlane.xlu1 %467 }
 0x34d   :  { %v519_v29 = vsel %vm518_vm7, %v499_v27, %v517_v28  ;;  %v511_v41 = vrot.slane %v468_v35, %v4605_v6 }
 0x34e   :  { %v465_v37 = vpop.xlane.xlu0 %464  ;;  %v521_v42 = vsel %vm520_vm12, %v503_v36, %v519_v29 }
 0x34f   :  { %v507_v40 = vrot.slane %v465_v37, %v4605_v6 }
 0x351   :  { %v523_v44 = vsel %vm522_vm14, %v507_v40, %v521_v42 }
 0x352   :  { %v525_v45 = vsel %vm524_vm0, %v511_v41, %v523_v44 }
 0x353   :  { %v599_v46 = vadd.f32 %v4411_v58, %v525_v45 }
 0x355   :  { %v602_v48 = vmul.f32 0.35355338, %v599_v46 }
 0x357   :  { %v603_v49 = vadd.f32 %v602_v48, %v4626_v47 }
 0x359   :  { %v604_v50 = vsel %vm5295_vm4, %v603_v49, -inf  ;;  %vm5303_vm4 = vmmov %vm5296_vm3 }
 0x35a   :  { %605 = vmax.xlane.f32.xlu0 %v604_v50 }
 0x370   :  { %615 = vrot.lane.b32.xlu0 %v4285_v17, %s4190_s20 }
 0x3e7   :  { %v606_v51 = vpop.xlane.xlu0 %605 }
 0x3e8   :  { %v607_v53 = vsub.f32 %v603_v49, %v606_v51 }
 0x3ea   :  { %v608_v54 = vmul.f32 1.442695, %v607_v53 }
 0x3eb   :  { %v616_v55 = vpop.permute.xlu0 %615 }
 0x3ec   :  { %4115 = vpow2.f32 %v608_v54  ;;  %3916 = vmatpush3.msra.mxu1 %v616_v55 }
 0x3ed   :  { %3920 = vmatprep.subr.mxu1 %v4185_v7 }
 0x3f6   :  { %v4116_v58 = vpop.eup %4115 }
 0x3f7   :  { %v610_v59 = vsel %vm5296_vm3, %v4116_v58, 0.0 }
 0x3f8   :  { %611 = vadd.xlane.f32.xlu1 %v610_v59 }
 0x409   :  { %814 = vrot.lane.b32.xlu1 %v4636_v60, %s4186_s12 }
 0x40d   :  { %340 = vrot.lane.b32.xlu1 %v4333_v38, %s4188_s17 }
 0x485   :  { %v612_v61 = vpop.xlane.xlu1 %611 }
 0x486   :  { %4117 = vrcp.f32 %v612_v61 }
 0x489   :  { %v815_v63 = vpop.permute.xlu1 %814 }
 0x48d   :  { %v341_v0 = vpop.permute.xlu1 %340 }
 0x48e   :  { %v345_v1 = vsel %vm5297_vm8, %v4328_v33, %v341_v0  ;;  %vm5304_vm8 = vmmov %vm5296_vm3 }
 0x48f   :  { %v692_v2 = vcombine.high %v345_v1, %v345_v1  ;;  %v699_v3 = vrot.slane %v345_v1, %v4409_v57 }
 0x490   :  { %v4118_v4 = vpop.eup %4117 }
 0x491   :  { %v706_v30 = vrot.slane %v692_v2, %v4409_v57  ;;  %v707_v5 = vcombine.high %v699_v3, %v699_v3  ;;  %v715_v9 = vrot.slane %v699_v3, %v4409_v57  ;;  %v614_v10 = vmul.f32 %v4118_v4, %v4116_v58 }
 0x493   :  { %v708_v11 = vcombine.high %v706_v30, %v706_v30  ;;  %3918 = vmatmul.mubr.msk.f32.vlgmr.msra.gmra.mrb[4].mxu1 %vm5298_vm5, %v614_v10  ;;  %v744_v38 = vrot.slane %v715_v9, %v4295_v21  ;;  %v729_v13 = vrot.slane %v707_v5, %v4409_v57  ;;  %v737_v14 = vcombine.high %v715_v9, %v715_v9  ;;  %vm5305_vm5 = vmmov %vm5296_vm3 }
 0x494   :  { %3921 = vmatpush3.xpose.msk.msra.mxu1 %vm5299_vm13, %v4292_v20  ;;  %3922 = vmatprep.mubr.msk.f32.mxu1 %vm5300_vm10, %v4185_v7  ;;  %v722_v33 = vrot.slane %v706_v30, %v4409_v57  ;;  %vm5306_vm13 = vmmov %vm5296_vm3 }
 0x495   :  { %v781_v15 = vmul.f32 %v4471_v12, %v744_v38  ;;  %v748_v16 = vrot.slane %v729_v13, %v4295_v21  ;;  %v752_v22 = vrot.slane %v737_v14, %v4295_v21  ;;  %v739_v25 = vcombine.high %v729_v13, %v729_v13 }
 0x496   :  { %v760_v39 = vrot.slane %v722_v33, %v4295_v21  ;;  %v738_v26 = vcombine.high %v722_v33, %v722_v33  ;;  %v736_v27 = vrot.slane %v708_v11, %v4409_v57 }
 0x497   :  { %3923 = vmatmul.mubr.msk.f32.vlgmr.msra.gmra.mrb[6].mxu1 %vm5301_vm15, %v815_v63  ;;  %v789_v28 = vsel %vm444_vm9, %v781_v15, 0.0  ;;  %v782_v29 = vmul.f32 %v4490_v18, %v748_v16  ;;  %v783_v35 = vmul.f32 %v4525_v34, %v752_v22  ;;  %v756_v36 = vrot.slane %v739_v25, %v4295_v21 }
 0x498   :  { %790 = vadd.xlane.f32.xlu0 %v789_v28  ;;  %v785_v40 = vmul.f32 %v4579_v52, %v760_v39  ;;  %v768_v41 = vrot.slane %v738_v26, %v4295_v21  ;;  %v764_v45 = vrot.slane %v736_v27, %v4295_v21  ;;  %v740_v46 = vcombine.high %v736_v27, %v736_v27 }
 0x499   :  { %v792_v37 = vsel %vm444_vm9, %v782_v29, 0.0  ;;  %v795_v42 = vsel %vm444_vm9, %v783_v35, 0.0  ;;  %v784_v44 = vmul.f32 %v4517_v32, %v756_v36  ;;  %vm5307_vm15 = vcmask 1046528  }
 0x49a   :  { %793 = vadd.xlane.f32.xlu1 %v792_v37  ;;  %v801_v48 = vsel %vm444_vm9, %v785_v40, 0.0  ;;  %v787_v49 = vmul.f32 %v4595_v62, %v768_v41  ;;  %v786_v51 = vmul.f32 %v4553_v43, %v764_v45  ;;  %v772_v53 = vrot.slane %v740_v46, %v4295_v21 }
 0x49b   :  { %v798_v50 = vsel %vm444_vm9, %v784_v44, 0.0 }
 0x49c   :  { %796 = vadd.xlane.f32.xlu0 %v795_v42  ;;  %v807_v54 = vsel %vm444_vm9, %v787_v49, 0.0  ;;  %v804_v55 = vsel %vm444_vm9, %v786_v51, 0.0  ;;  %v788_v58 = vmul.f32 %v4589_v56, %v772_v53 }
 0x49e   :  { %802 = vadd.xlane.f32.xlu1 %v801_v48  ;;  %v810_v59 = vsel %vm444_vm9, %v788_v58, 0.0 }
 0x4a0   :  { %799 = vadd.xlane.f32.xlu0 %v798_v50 }
 0x4a2   :  { %808 = vadd.xlane.f32.xlu1 %v807_v54 }
 0x4a4   :  { %805 = vadd.xlane.f32.xlu0 %v804_v55 }
 0x4a8   :  { %811 = vadd.xlane.f32.xlu0 %v810_v59 }
 0x4b3   :  { %1032 = vrot.lane.b32.xlu1 %v4302_v24, %s4191_s21 }
 0x4b7   :  { %1030 = vrot.lane.b32.xlu1 %v4298_v23, %s4192_s22 }
 0x4be   :  { %1028 = vrot.lane.b32.xlu0 %v4288_v19, %s4192_s22 }
 0x525   :  { %v791_v61 = vpop.xlane.xlu0 %790 }
 0x526   :  { %v827_v38 = vrot.slane %v791_v61, %v4605_v6 }
 0x527   :  { %v794_v63 = vpop.xlane.xlu1 %793 }
 0x528   :  { %v831_v11 = vrot.slane %v794_v63, %v4605_v6 }
 0x529   :  { %v797_v0 = vpop.xlane.xlu0 %796 }
 0x52a   :  { %v835_v13 = vrot.slane %v797_v0, %v4605_v6  ;;  %v856_v14 = vsel %vm512_vm1, %v831_v11, %v827_v38 }
 0x52b   :  { %v803_v1 = vpop.xlane.xlu1 %802 }
 0x52c   :  { %v857_v15 = vsel %vm514_vm2, %v835_v13, %v856_v14  ;;  %v843_v25 = vrot.slane %v803_v1, %v4605_v6 }
 0x52d   :  { %v800_v2 = vpop.xlane.xlu0 %799 }
 0x52e   :  { %v839_v33 = vrot.slane %v800_v2, %v4605_v6 }
 0x52f   :  { %v809_v3 = vpop.xlane.xlu1 %808 }
 0x530   :  { %v858_v16 = vsel %vm516_vm11, %v839_v33, %v857_v15  ;;  %v851_v29 = vrot.slane %v809_v3, %v4605_v6 }
 0x531   :  { %v806_v4 = vpop.xlane.xlu0 %805  ;;  %v859_v39 = vsel %vm518_vm7, %v843_v25, %v858_v16 }
 0x532   :  { %v847_v22 = vrot.slane %v806_v4, %v4605_v6 }
 0x533   :  { %v1033_v30 = vpop.permute.xlu1 %1032 }
 0x534   :  { %3930 = vmatprep.subr.msk.mxu1 %vm5302_vm6, %v1033_v30  ;;  %v860_v28 = vsel %vm520_vm12, %v847_v22, %v859_v39  ;;  %vm5308_vm6 = vmmov %vm5307_vm15 }
 0x535   :  { %3931 = vmatpush3.xpose.msk.msra.mxu1 %vm5303_vm4, %v1033_v30  ;;  %v812_v5 = vpop.xlane.xlu0 %811  ;;  %v861_v36 = vsel %vm522_vm14, %v851_v29, %v860_v28  ;;  %vm5309_vm4 = vmmov %vm5296_vm3 }
 0x536   :  { %3940 = vmatprep.subr.mxu1 %v4185_v7  ;;  %v855_v26 = vrot.slane %v812_v5, %v4605_v6 }
 0x537   :  { %v1031_v10 = vpop.permute.xlu1 %1030 }
 0x538   :  { %v862_v37 = vsel %vm524_vm0, %v855_v26, %v861_v36 }
 0x539   :  { %v1029_v9 = vpop.permute.xlu0 %1028 }
 0x53a   :  { %3932 = vmatprep.mubr.msk.f32.mxu1 %vm5296_vm3, %v1029_v9 }
 0x53b   :  { %3933 = vmatmul.mubr.msk.f32.vlgmr.msra.gmra.mrb[8].mxu1 %vm5304_vm8, %v1031_v10  ;;  %vm5310_vm8 = vmmov %vm5296_vm3 }
 0x53c   :  { %3942 = vmatprep.mubr.msk.f32.mxu1 %vm5300_vm10, %v4185_v7 }
 0x566   :  { %v4704_v27 = vpop.f32.mrb[4].mxu1 }
 0x567   :  { %v3919_v35 = vpop.f32.mrb[5].mxu1 }
 0x56a   :  { %v935_v40 = vpop.f32.mrb[6].mxu1 }
 0x56b   :  { %v936_v41 = vadd.f32 %v935_v40, %v862_v37  ;;  %v3924_v42 = vpop.f32.mrb[7].mxu1 }
 0x56d   :  { %v939_v44 = vmul.f32 0.35355338, %v936_v41 }
 0x56f   :  { %v940_v45 = vadd.f32 %v939_v44, %v4626_v47 }
 0x571   :  { %v941_v46 = vsel %vm5305_vm5, %v940_v45, -inf  ;;  %vm5311_vm5 = vmmov %vm5296_vm3 }
 0x572   :  { %942 = vmax.xlane.f32.xlu1 %v941_v46 }
 0x583   :  { %1256 = vrot.lane.b32.xlu1 %v4285_v17, %s4193_s23 }
 0x587   :  { %1254 = vrot.lane.b32.xlu1 %v4315_v31, %s4192_s22 }
 0x58b   :  { %1591 = vrot.lane.b32.xlu1 %v4636_v60, %s4192_s22 }
 0x5ff   :  { %v943_v48 = vpop.xlane.xlu1 %942 }
 0x600   :  { %v944_v49 = vsub.f32 %v940_v45, %v943_v48 }
 0x602   :  { %v945_v50 = vmul.f32 1.442695, %v944_v49 }
 0x603   :  { %v1257_v0 = vpop.permute.xlu1 %1256 }
 0x604   :  { %4119 = vpow2.f32 %v945_v50 }
 0x607   :  { %v1255_v2 = vpop.permute.xlu1 %1254 }
 0x60b   :  { %v1592_v30 = vpop.permute.xlu1 %1591 }
 0x60e   :  { %v4120_v51 = vpop.eup %4119  ;;  %v3934_v53 = vpop.f32.mrb[8].mxu1 }
 0x60f   :  { %v1118_v54 = vrot.slane %v3934_v53, 1  ;;  %v1106_v55 = vpop.f32.mrb[9].mxu1  ;;  %v947_v58 = vsel %vm5306_vm13, %v4120_v51, 0.0  ;;  %vm5312_vm13 = vmmov %vm5296_vm3 }
 0x610   :  { %v1117_v59 = vrot.slane %v1106_v55, 1  ;;  %948 = vadd.xlane.f32.xlu0 %v947_v58 }
 0x612   :  { %v1122_v61 = vsel %vm5307_vm15, %v1118_v54, %v1117_v59  ;;  %v1119_v63 = vsel %vm5308_vm6, %v1117_v59, %v1118_v54  ;;  %vm5313_vm15 = vmmov %vm5296_vm3 }
 0x613   :  { %1126 = vrot.lane.b32.xlu1 %v1122_v61, %s4188_s17  ;;  %vm5314_vm6 = vmmov %vm5296_vm3 }
 0x626   :  { %952 = vrot.lane.b32.xlu0 %v4292_v20, %s4190_s20 }
 0x62a   :  { %1593 = vrot.lane.b32.xlu0 %v4292_v20, %s4193_s23 }
 0x62e   :  { %1124 = vrot.lane.b32.xlu0 %v1119_v63, %s4188_s17 }
 0x685   :  { %v1127_v11 = vpop.permute.xlu1 %1126 }
 0x686   :  { %v1131_v33 = vsel %vm5311_vm5, %v3934_v53, %v1127_v11  ;;  %vm5317_vm5 = vmmov %vm5296_vm3 }
 0x687   :  { %v1477_v29 = vrot.slane %v1131_v33, %v4409_v57 }
 0x689   :  { %v1493_v53 = vrot.slane %v1477_v29, %v4409_v57  ;;  %v1485_v59 = vcombine.high %v1477_v29, %v1477_v29 }
 0x69d   :  { %v949_v1 = vpop.xlane.xlu0 %948 }
 0x69e   :  { %4121 = vrcp.f32 %v949_v1 }
 0x6a1   :  { %v953_v3 = vpop.permute.xlu0 %952 }
 0x6a2   :  { %3926 = vmatpush3.msra.mxu0 %v953_v3 }
 0x6a3   :  { %3935 = vmatprep.subr.mxu0 %v4185_v7 }
 0x6a5   :  { %v1594_v4 = vpop.permute.xlu0 %1593 }
 0x6a8   :  { %v4122_v5 = vpop.eup %4121 }
 0x6a9   :  { %v951_v9 = vmul.f32 %v4122_v5, %v4120_v51  ;;  %v1125_v10 = vpop.permute.xlu0 %1124  ;;  %v1470_v51 = vcombine.high %v1131_v33, %v1131_v33  ;;  %v1515_v5 = vcombine.high %v1493_v53, %v1493_v53 }
 0x6aa   :  { %v1130_v38 = vsel %vm5309_vm4, %v1106_v55, %v1125_v10  ;;  %vm5315_vm4 = vmmov %vm5296_vm3 }
 0x6ab   :  { %v1133_v13 = vcombine.high %v1130_v38, %v1130_v38  ;;  %v1140_v14 = vrot.slane %v1130_v38, %v4409_v57  ;;  %3928 = vmatmul.mubr.msk.f32.vlgmr.msra.gmra.mrb[6].mxu0 %vm5296_vm3, %v951_v9  ;;  %v1507_v38 = vrot.slane %v1485_v59, %v4409_v57  ;;  %v1530_v33 = vrot.slane %v1515_v5, %v4295_v21 }
 0x6ac   :  { %3936 = vmatpush3.xpose.msk.msra.mxu0 %vm5310_vm8, %v1257_v0  ;;  %3937 = vmatprep.mubr.msk.f32.mxu0 %vm5300_vm10, %v4185_v7  ;;  %vm5316_vm8 = vmmov %vm5296_vm3 }
 0x6ad   :  { %v1147_v15 = vrot.slane %v1133_v13, %v4409_v57  ;;  %v1148_v16 = vcombine.high %v1140_v14, %v1140_v14  ;;  %v1156_v22 = vrot.slane %v1140_v14, %v4409_v57  ;;  %3945 = vmatprep.subr.mxu0 %v4185_v7  ;;  %v1561_v29 = vmul.f32 %v4525_v34, %v1530_v33 }
 0x6af   :  { %v1149_v25 = vcombine.high %v1147_v15, %v1147_v15  ;;  %3938 = vmatmul.mubr.msk.f32.vlgmr.msra.gmra.mrb[8].mxu0 %vm5312_vm13, %v1255_v2  ;;  %v1185_v39 = vrot.slane %v1156_v22, %v4295_v21  ;;  %v1170_v26 = vrot.slane %v1148_v16, %v4409_v57  ;;  %v1178_v28 = vcombine.high %v1156_v22, %v1156_v22  ;;  %vm5318_vm13 = vmmov %vm5296_vm3 }
 0x6b0   :  { %3946 = vmatpush3.xpose.msk.msra.mxu0 %vm5313_vm15, %v1594_v4  ;;  %3947 = vmatprep.mubr.msk.f32.mxu0 %vm5300_vm10, %v4185_v7  ;;  %v1163_v35 = vrot.slane %v1147_v15, %v4409_v57  ;;  %v1484_v2 = vrot.slane %v1470_v51, %v4409_v57  ;;  %vm5319_vm15 = vmmov %vm5296_vm3 }
 0x6b1   :  { %v1222_v36 = vmul.f32 %v4471_v12, %v1185_v39  ;;  %v1189_v37 = vrot.slane %v1170_v26, %v4295_v21  ;;  %v1193_v40 = vrot.slane %v1178_v28, %v4295_v21  ;;  %v1180_v41 = vcombine.high %v1170_v26, %v1170_v26 }
 0x6b2   :  { %v1201_v42 = vrot.slane %v1163_v35, %v4295_v21  ;;  %v1179_v44 = vcombine.high %v1163_v35, %v1163_v35  ;;  %v1177_v45 = vrot.slane %v1149_v25, %v4409_v57  ;;  %v1500_v15 = vrot.slane %v1484_v2, %v4409_v57 }
 0x6b3   :  { %3948 = vmatmul.mubr.msk.f32.vlgmr.msra.gmra.mrb[10].mxu0 %vm5314_vm6, %v1592_v30  ;;  %v1230_v46 = vsel %vm444_vm9, %v1222_v36, 0.0  ;;  %v1223_v48 = vmul.f32 %v4490_v18, %v1189_v37  ;;  %v1224_v49 = vmul.f32 %v4525_v34, %v1193_v40  ;;  %v1197_v50 = vrot.slane %v1180_v41, %v4295_v21  ;;  %vm5320_vm6 = vmmov %vm5296_vm3 }
 0x6b4   :  { %1231 = vadd.xlane.f32.xlu0 %v1230_v46  ;;  %v1226_v55 = vmul.f32 %v4579_v52, %v1201_v42  ;;  %v1209_v58 = vrot.slane %v1179_v44, %v4295_v21  ;;  %v1205_v0 = vrot.slane %v1177_v45, %v4295_v21  ;;  %v1181_v1 = vcombine.high %v1177_v45, %v1177_v45 }
 0x6b5   :  { %v1233_v54 = vsel %vm444_vm9, %v1223_v48, 0.0  ;;  %v1236_v61 = vsel %vm444_vm9, %v1224_v49, 0.0  ;;  %v1225_v63 = vmul.f32 %v4517_v32, %v1197_v50  ;;  %v1522_v30 = vrot.slane %v1493_v53, %v4295_v21 }
 0x6b6   :  { %1234 = vadd.xlane.f32.xlu1 %v1233_v54  ;;  %v1242_v3 = vsel %vm444_vm9, %v1226_v55, 0.0  ;;  %v1228_v4 = vmul.f32 %v4595_v62, %v1209_v58  ;;  %v1227_v10 = vmul.f32 %v4553_v43, %v1205_v0  ;;  %v1213_v11 = vrot.slane %v1181_v1, %v4295_v21 }
 0x6b7   :  { %v1239_v9 = vsel %vm444_vm9, %v1225_v63, 0.0  ;;  %v1559_v14 = vmul.f32 %v4471_v12, %v1522_v30  ;;  %v1486_v16 = vcombine.high %v1484_v2, %v1484_v2  ;;  %v1526_v39 = vrot.slane %v1507_v38, %v4295_v21 }
 0x6b8   :  { %1237 = vadd.xlane.f32.xlu0 %v1236_v61  ;;  %v1248_v13 = vsel %vm444_vm9, %v1228_v4, 0.0  ;;  %v1245_v22 = vsel %vm444_vm9, %v1227_v10, 0.0  ;;  %v1229_v25 = vmul.f32 %v4589_v56, %v1213_v11  ;;  %v1517_v26 = vcombine.high %v1507_v38, %v1507_v38 }
 0x6b9   :  { %v1567_v28 = vsel %vm444_vm9, %v1559_v14, 0.0  ;;  %v1538_v35 = vrot.slane %v1500_v15, %v4295_v21  ;;  %v1516_v36 = vcombine.high %v1500_v15, %v1500_v15  ;;  %v1560_v40 = vmul.f32 %v4490_v18, %v1526_v39 }
 0x6ba   :  { %1243 = vadd.xlane.f32.xlu1 %v1242_v3  ;;  %v1251_v37 = vsel %vm444_vm9, %v1229_v25, 0.0  ;;  %v1534_v41 = vrot.slane %v1517_v26, %v4295_v21  ;;  %v1514_v42 = vrot.slane %v1486_v16, %v4409_v57  ;;  %v1573_v44 = vsel %vm444_vm9, %v1561_v29, 0.0 }
 0x6bb   :  { %v1563_v45 = vmul.f32 %v4579_v52, %v1538_v35  ;;  %v1546_v46 = vrot.slane %v1516_v36, %v4295_v21  ;;  %v1570_v48 = vsel %vm444_vm9, %v1560_v40, 0.0 }
 0x6bc   :  { %1240 = vadd.xlane.f32.xlu0 %v1239_v9  ;;  %v1562_v49 = vmul.f32 %v4517_v32, %v1534_v41  ;;  %v1542_v50 = vrot.slane %v1514_v42, %v4295_v21  ;;  %v1518_v51 = vcombine.high %v1514_v42, %v1514_v42 }
 0x6bd   :  { %v1579_v53 = vsel %vm444_vm9, %v1563_v45, 0.0  ;;  %v1565_v54 = vmul.f32 %v4595_v62, %v1546_v46 }
 0x6be   :  { %1249 = vadd.xlane.f32.xlu1 %v1248_v13  ;;  %v1576_v55 = vsel %vm444_vm9, %v1562_v49, 0.0  ;;  %v1564_v58 = vmul.f32 %v4553_v43, %v1542_v50  ;;  %v1550_v59 = vrot.slane %v1518_v51, %v4295_v21 }
 0x6bf   :  { %v1585_v61 = vsel %vm444_vm9, %v1565_v54, 0.0 }
 0x6c0   :  { %1246 = vadd.xlane.f32.xlu0 %v1245_v22  ;;  %v1582_v63 = vsel %vm444_vm9, %v1564_v58, 0.0  ;;  %v1566_v0 = vmul.f32 %v4589_v56, %v1550_v59 }
 0x6c2   :  { %1568 = vadd.xlane.f32.xlu1 %v1567_v28  ;;  %v1588_v1 = vsel %vm444_vm9, %v1566_v0, 0.0 }
 0x6c4   :  { %1252 = vadd.xlane.f32.xlu0 %v1251_v37 }
 0x6c6   :  { %1574 = vadd.xlane.f32.xlu1 %v1573_v44 }
 0x6c8   :  { %1571 = vadd.xlane.f32.xlu0 %v1570_v48 }
 0x6ca   :  { %1580 = vadd.xlane.f32.xlu1 %v1579_v53 }
 0x6cc   :  { %1577 = vadd.xlane.f32.xlu0 %v1576_v55 }
 0x6ce   :  { %1586 = vadd.xlane.f32.xlu1 %v1585_v61 }
 0x6d0   :  { %1583 = vadd.xlane.f32.xlu0 %v1582_v63 }
 0x6d4   :  { %1589 = vadd.xlane.f32.xlu0 %v1588_v1 }
 0x6df   :  { %1810 = vrot.lane.b32.xlu1 %v4302_v24, %s4194_s24 }
 0x6e3   :  { %1808 = vrot.lane.b32.xlu1 %v4298_v23, %s4195_s25 }
 0x6ea   :  { %1806 = vrot.lane.b32.xlu0 %v4288_v19, %s4195_s25 }
 0x741   :  { %v1232_v2 = vpop.xlane.xlu0 %1231 }
 0x742   :  { %v1269_v35 = vrot.slane %v1232_v2, %v4605_v6 }
 0x743   :  { %v1235_v3 = vpop.xlane.xlu1 %1234 }
 0x744   :  { %v1273_v29 = vrot.slane %v1235_v3, %v4605_v6 }
 0x745   :  { %v1238_v4 = vpop.xlane.xlu0 %1237 }
 0x746   :  { %v1277_v36 = vrot.slane %v1238_v4, %v4605_v6  ;;  %v1298_v37 = vsel %vm512_vm1, %v1273_v29, %v1269_v35 }
 0x747   :  { %v1244_v30 = vpop.xlane.xlu1 %1243 }
 0x748   :  { %v1299_v44 = vsel %vm514_vm2, %v1277_v36, %v1298_v37  ;;  %v1285_v50 = vrot.slane %v1244_v30, %v4605_v6 }
 0x749   :  { %v1241_v5 = vpop.xlane.xlu0 %1240 }
 0x74a   :  { %v1281_v40 = vrot.slane %v1241_v5, %v4605_v6 }
 0x74b   :  { %v1250_v9 = vpop.xlane.xlu1 %1249 }
 0x74c   :  { %v1300_v45 = vsel %vm516_vm11, %v1281_v40, %v1299_v44  ;;  %v1293_v0 = vrot.slane %v1250_v9, %v4605_v6 }
 0x74d   :  { %v1247_v10 = vpop.xlane.xlu0 %1246  ;;  %v1301_v53 = vsel %vm518_vm7, %v1285_v50, %v1300_v45 }
 0x74e   :  { %v1289_v46 = vrot.slane %v1247_v10, %v4605_v6 }
 0x74f   :  { %v1569_v11 = vpop.xlane.xlu1 %1568 }
 0x750   :  { %v1606_v42 = vrot.slane %v1569_v11, %v4605_v6  ;;  %v1302_v55 = vsel %vm520_vm12, %v1289_v46, %v1301_v53 }
 0x751   :  { %v1253_v38 = vpop.xlane.xlu0 %1252  ;;  %v1303_v4 = vsel %vm522_vm14, %v1293_v0, %v1302_v55 }
 0x752   :  { %v1297_v58 = vrot.slane %v1253_v38, %v4605_v6 }
 0x753   :  { %v1575_v13 = vpop.xlane.xlu1 %1574 }
 0x754   :  { %v1614_v51 = vrot.slane %v1575_v13, %v4605_v6  ;;  %v1304_v10 = vsel %vm524_vm0, %v1297_v58, %v1303_v4 }
 0x755   :  { %v1572_v14 = vpop.xlane.xlu0 %1571 }
 0x756   :  { %v1610_v41 = vrot.slane %v1572_v14, %v4605_v6 }
 0x757   :  { %v1581_v33 = vpop.xlane.xlu1 %1580 }
 0x758   :  { %v1635_v48 = vsel %vm512_vm1, %v1610_v41, %v1606_v42  ;;  %v1622_v1 = vrot.slane %v1581_v33, %v4605_v6 }
 0x759   :  { %v1578_v15 = vpop.xlane.xlu0 %1577  ;;  %v1636_v54 = vsel %vm514_vm2, %v1614_v51, %v1635_v48 }
 0x75a   :  { %v1618_v49 = vrot.slane %v1578_v15, %v4605_v6 }
 0x75b   :  { %v1587_v16 = vpop.xlane.xlu1 %1586 }
 0x75c   :  { %v1637_v59 = vsel %vm516_vm11, %v1618_v49, %v1636_v54  ;;  %v1630_v38 = vrot.slane %v1587_v16, %v4605_v6 }
 0x75d   :  { %v1584_v22 = vpop.xlane.xlu0 %1583  ;;  %v1638_v3 = vsel %vm518_vm7, %v1622_v1, %v1637_v59 }
 0x75e   :  { %v1626_v61 = vrot.slane %v1584_v22, %v4605_v6 }
 0x75f   :  { %v1811_v25 = vpop.permute.xlu1 %1810 }
 0x760   :  { %3955 = vmatprep.subr.msk.mxu0 %vm5315_vm4, %v1811_v25  ;;  %v1639_v30 = vsel %vm520_vm12, %v1626_v61, %v1638_v3  ;;  %vm5321_vm4 = vmmov %vm5296_vm3 }
 0x761   :  { %3956 = vmatpush3.xpose.msk.msra.mxu0 %vm5296_vm3, %v1811_v25  ;;  %v1590_v39 = vpop.xlane.xlu0 %1589  ;;  %v1640_v9 = vsel %vm522_vm14, %v1630_v38, %v1639_v30  ;;  %vm5322_vm3 = vcmask 1046528  }
 0x762   :  { %3965 = vmatprep.subr.mxu0 %v4185_v7  ;;  %v1634_v5 = vrot.slane %v1590_v39, %v4605_v6 }
 0x763   :  { %v1809_v28 = vpop.permute.xlu1 %1808 }
 0x764   :  { %v1641_v33 = vsel %vm524_vm0, %v1634_v5, %v1640_v9 }
 0x765   :  { %v1807_v26 = vpop.permute.xlu0 %1806 }
 0x766   :  { %3957 = vmatprep.mubr.msk.f32.mxu0 %vm5316_vm8, %v1807_v26  ;;  %vm5323_vm8 = vmmov %vm5322_vm3 }
 0x767   :  { %3958 = vmatmul.mubr.msk.f32.vlgmr.msra.gmra.mrb[12].mxu0 %vm5317_vm5, %v1809_v28  ;;  %vm5324_vm5 = vmmov %vm5321_vm4 }
 0x768   :  { %3967 = vmatprep.mubr.msk.f32.mxu0 %vm5300_vm10, %v4185_v7 }
 0x77e   :  { %v4831_v63 = vpop.f32.mrb[6].mxu0 }
 0x77f   :  { %v3929_v2 = vpop.f32.mrb[7].mxu0 }
 0x782   :  { %v1376_v11 = vpop.f32.mrb[8].mxu0 }
 0x783   :  { %v1377_v13 = vadd.f32 %v1376_v11, %v1304_v10  ;;  %v3939_v14 = vpop.f32.mrb[9].mxu0 }
 0x785   :  { %v1380_v15 = vmul.f32 0.35355338, %v1377_v13 }
 0x786   :  { %v1713_v22 = vpop.f32.mrb[10].mxu0 }
 0x787   :  { %v1714_v25 = vadd.f32 %v1713_v22, %v1641_v33  ;;  %v3949_v26 = vpop.f32.mrb[11].mxu0  ;;  %v1381_v28 = vadd.f32 %v1380_v15, %v4626_v47 }
 0x789   :  { %v1717_v29 = vmul.f32 0.35355338, %v1714_v25  ;;  %v1382_v39 = vsel %vm5318_vm13, %v1381_v28, -inf  ;;  %vm5325_vm13 = vmmov %vm5321_vm4 }
 0x78a   :  { %1383 = vmax.xlane.f32.xlu1 %v1382_v39 }
 0x78b   :  { %v1718_v35 = vadd.f32 %v1717_v29, %v4626_v47 }
 0x78d   :  { %v1719_v16 = vsel %vm5319_vm15, %v1718_v35, -inf  ;;  %vm5326_vm15 = vmmov %vm5321_vm4 }
 0x78e   :  { %1720 = vmax.xlane.f32.xlu0 %v1719_v16 }
 0x79b   :  { %1730 = vrot.lane.b32.xlu1 %v4292_v20, %s4196_s26 }
 0x79f   :  { %2034 = vrot.lane.b32.xlu1 %v4285_v17, %s4197_s27 }
 0x817   :  { %v1384_v36 = vpop.xlane.xlu1 %1383 }
 0x818   :  { %v1385_v37 = vsub.f32 %v1381_v28, %v1384_v36 }
 0x81a   :  { %v1386_v40 = vmul.f32 1.442695, %v1385_v37 }
 0x81b   :  { %v1721_v41 = vpop.xlane.xlu0 %1720  ;;  %v1731_v58 = vpop.permute.xlu1 %1730 }
 0x81c   :  { %4123 = vpow2.f32 %v1386_v40  ;;  %v1722_v42 = vsub.f32 %v1718_v35, %v1721_v41 }
 0x81e   :  { %v1723_v44 = vmul.f32 1.442695, %v1722_v42 }
 0x81f   :  { %v2035_v59 = vpop.permute.xlu1 %2034 }
 0x820   :  { %4125 = vpow2.f32 %v1723_v44 }
 0x826   :  { %v4124_v45 = vpop.eup %4123 }
 0x827   :  { %v1388_v47 = vsel %vm5320_vm6, %v4124_v45, 0.0  ;;  %vm5327_vm6 = vmmov %vm5321_vm4 }
 0x828   :  { %1389 = vadd.xlane.f32.xlu0 %v1388_v47 }
 0x82a   :  { %v4126_v46 = vpop.eup %4125 }
 0x82b   :  { %v1725_v48 = vsel %vm5321_vm4, %v4126_v46, 0.0 }
 0x82c   :  { %1726 = vadd.xlane.f32.xlu1 %v1725_v48 }
 0x83a   :  { %v3959_v49 = vpop.f32.mrb[12].mxu0 }
 0x83b   :  { %v1896_v50 = vrot.slane %v3959_v49, 1  ;;  %v1884_v51 = vpop.f32.mrb[13].mxu0 }
 0x83c   :  { %v1895_v53 = vrot.slane %v1884_v51, 1 }
 0x83d   :  { %2371 = vrot.lane.b32.xlu1 %v4292_v20, %s4197_s27 }
 0x83e   :  { %1393 = vrot.lane.b32.xlu0 %v4285_v17, %s4196_s26  ;;  %v1897_v54 = vsel %vm5322_vm3, %v1895_v53, %v1896_v50  ;;  %v1900_v55 = vsel %vm5323_vm8, %v1896_v50, %v1895_v53  ;;  %vm5328_vm3 = vmmov %vm5321_vm4 }
 0x83f   :  { %vm5329_vm8 = vmmov %vm5328_vm3 }
 0x841   :  { %1902 = vrot.lane.b32.xlu1 %v1897_v54, %s4188_s17 }
 0x842   :  { %2032 = vrot.lane.b32.xlu0 %v4315_v31, %s4195_s25 }
 0x846   :  { %2369 = vrot.lane.b32.xlu0 %v4636_v60, %s4195_s25 }
 0x84a   :  { %1904 = vrot.lane.b32.xlu0 %v1900_v55, %s4188_s17 }
 0x8b5   :  { %v1390_v61 = vpop.xlane.xlu0 %1389 }
 0x8b6   :  { %4127 = vrcp.f32 %v1390_v61 }
 0x8b9   :  { %v1727_v0 = vpop.xlane.xlu1 %1726  ;;  %v1394_v1 = vpop.permute.xlu0 %1393 }
 0x8ba   :  { %4129 = vrcp.f32 %v1727_v0  ;;  %3941 = vmatpush3.msra.mxu1 %v1394_v1 }
 0x8bb   :  { %3950 = vmatprep.subr.mxu1 %v4185_v7 }
 0x8bd   :  { %v2372_v2 = vpop.permute.xlu1 %2371  ;;  %v2033_v3 = vpop.permute.xlu0 %2032 }
 0x8c0   :  { %v4128_v4 = vpop.eup %4127 }
 0x8c1   :  { %v1392_v30 = vmul.f32 %v4128_v4, %v4124_v45  ;;  %v2370_v5 = vpop.permute.xlu0 %2369  ;;  %v1903_v10 = vpop.permute.xlu1 %1902 }
 0x8c2   :  { %v1908_v11 = vsel %vm5324_vm5, %v1884_v51, %v1903_v10  ;;  %vm5330_vm5 = vmmov %vm5328_vm3 }
 0x8c3   :  { %v1911_v38 = vcombine.high %v1908_v11, %v1908_v11  ;;  %v1918_v13 = vrot.slane %v1908_v11, %v4409_v57  ;;  %3943 = vmatmul.mubr.msk.f32.vlgmr.msra.gmra.mrb[10].mxu1 %vm5325_vm13, %v1392_v30  ;;  %vm5331_vm13 = vmmov %vm5328_vm3 }
 0x8c4   :  { %v4130_v14 = vpop.eup %4129  ;;  %3951 = vmatpush3.msra.mxu1 %v1731_v58  ;;  %3952 = vmatprep.mubr.msk.f32.mxu1 %vm5300_vm10, %v4185_v7 }
 0x8c5   :  { %v1729_v15 = vmul.f32 %v4130_v14, %v4126_v46  ;;  %v1925_v9 = vrot.slane %v1911_v38, %v4409_v57  ;;  %v1926_v33 = vcombine.high %v1918_v13, %v1918_v13  ;;  %v1934_v22 = vrot.slane %v1918_v13, %v4409_v57  ;;  %v1905_v25 = vpop.permute.xlu0 %1904  ;;  %3960 = vmatprep.subr.mxu1 %v4185_v7 }
 0x8c6   :  { %v1909_v26 = vsel %vm5326_vm15, %v3959_v49, %v1905_v25  ;;  %vm5332_vm15 = vmmov %vm5328_vm3 }
 0x8c7   :  { %v1927_v28 = vcombine.high %v1925_v9, %v1925_v9  ;;  %3953 = vmatmul.mubr.msk.f32.vlgmr.msra.gmra.mrb[12].mxu1 %vm5327_vm6, %v1729_v15  ;;  %v1963_v29 = vrot.slane %v1934_v22, %v4295_v21  ;;  %v2255_v39 = vrot.slane %v1909_v26, %v4409_v57  ;;  %v1948_v35 = vrot.slane %v1926_v33, %v4409_v57  ;;  %vm5333_vm6 = vmmov %vm5328_vm3 }
 0x8c8   :  { %3962 = vmatprep.mubr.msk.f32.mxu1 %vm5300_vm10, %v4185_v7  ;;  %v1956_v16 = vcombine.high %v1934_v22, %v1934_v22  ;;  %v1941_v37 = vrot.slane %v1925_v9, %v4409_v57  ;;  %v2248_v45 = vcombine.high %v1909_v26, %v1909_v26 }
 0x8c9   :  { %v2000_v36 = vmul.f32 %v4471_v12, %v1963_v29  ;;  %v1967_v40 = vrot.slane %v1948_v35, %v4295_v21  ;;  %v1958_v41 = vcombine.high %v1948_v35, %v1948_v35  ;;  %v1955_v44 = vrot.slane %v1927_v28, %v4409_v57 }
 0x8ca   :  { %v1971_v42 = vrot.slane %v1956_v16, %v4295_v21  ;;  %v2263_v46 = vcombine.high %v2255_v39, %v2255_v39  ;;  %v1979_v51 = vrot.slane %v1941_v37, %v4295_v21  ;;  %v2262_v61 = vrot.slane %v2248_v45, %v4409_v57 }
 0x8cb   :  { %3961 = vmatpush3.xpose.msk.msra.mxu1 %vm5321_vm4, %v2035_v59  ;;  %v2008_v47 = vsel %vm444_vm9, %v2000_v36, 0.0  ;;  %v2001_v48 = vmul.f32 %v4490_v18, %v1967_v40  ;;  %v1975_v49 = vrot.slane %v1958_v41, %v4295_v21  ;;  %v1983_v50 = vrot.slane %v1955_v44, %v4295_v21  ;;  %vm5334_vm4 = vmmov %vm5328_vm3 }
 0x8cc   :  { %2009 = vadd.xlane.f32.xlu1 %v2008_v47  ;;  %3970 = vmatprep.subr.mxu1 %v4185_v7  ;;  %v1959_v53 = vcombine.high %v1955_v44, %v1955_v44  ;;  %v2002_v58 = vmul.f32 %v4525_v34, %v1971_v42  ;;  %v1957_v59 = vcombine.high %v1941_v37, %v1941_v37 }
 0x8cd   :  { %v2011_v54 = vsel %vm444_vm9, %v2001_v48, 0.0  ;;  %v2003_v55 = vmul.f32 %v4517_v32, %v1975_v49  ;;  %v2005_v1 = vmul.f32 %v4553_v43, %v1983_v50  ;;  %v2285_v4 = vrot.slane %v2263_v46, %v4409_v57 }
 0x8ce   :  { %3963 = vmatmul.mubr.msk.f32.vlgmr.msra.gmra.mrb[14].mxu1 %vm5328_vm3, %v2033_v3  ;;  %2012 = vadd.xlane.f32.xlu0 %v2011_v54  ;;  %v1991_v3 = vrot.slane %v1959_v53, %v4295_v21  ;;  %v2271_v30 = vrot.slane %v2255_v39, %v4409_v57  ;;  %v2014_v10 = vsel %vm444_vm9, %v2002_v58, 0.0  ;;  %v1987_v11 = vrot.slane %v1957_v59, %v4295_v21 }
 0x8cf   :  { %3971 = vmatpush3.xpose.msk.msra.mxu1 %vm5329_vm8, %v2372_v2  ;;  %3972 = vmatprep.mubr.msk.f32.mxu1 %vm5300_vm10, %v4185_v7  ;;  %v2017_v0 = vsel %vm444_vm9, %v2003_v55, 0.0  ;;  %v2004_v2 = vmul.f32 %v4579_v52, %v1979_v51  ;;  %v2264_v38 = vcombine.high %v2262_v61, %v2262_v61  ;;  %v2023_v13 = vsel %vm444_vm9, %v2005_v1, 0.0  ;;  %vm5335_vm8 = vmmov %vm5328_vm3 }
 0x8d0   :  { %2018 = vadd.xlane.f32.xlu1 %v2017_v0  ;;  %v2007_v14 = vmul.f32 %v4589_v56, %v1991_v3  ;;  %v2304_v15 = vrot.slane %v2285_v4, %v4295_v21  ;;  %v2295_v9 = vcombine.high %v2285_v4, %v2285_v4  ;;  %v2300_v22 = vrot.slane %v2271_v30, %v4295_v21 }
 0x8d1   :  { %v2020_v33 = vsel %vm444_vm9, %v2004_v2, 0.0  ;;  %v2293_v25 = vcombine.high %v2271_v30, %v2271_v30  ;;  %v2292_v39 = vrot.slane %v2264_v38, %v4409_v57  ;;  %v2278_v37 = vrot.slane %v2262_v61, %v4409_v57 }
 0x8d2   :  { %3973 = vmatmul.mubr.msk.f32.vlgmr.msra.gmra.mrb[16].mxu1 %vm5330_vm5, %v2370_v5  ;;  %2015 = vadd.xlane.f32.xlu0 %v2014_v10  ;;  %v2006_v5 = vmul.f32 %v4595_v62, %v1987_v11  ;;  %v2029_v26 = vsel %vm444_vm9, %v2007_v14, 0.0  ;;  %v2338_v28 = vmul.f32 %v4490_v18, %v2304_v15  ;;  %v2312_v29 = vrot.slane %v2295_v9, %v4295_v21  ;;  %vm5336_vm5 = vmmov %vm5328_vm3 }
 0x8d3   :  { %v2337_v16 = vmul.f32 %v4471_v12, %v2300_v22  ;;  %v2308_v36 = vrot.slane %v2293_v25, %v4295_v21  ;;  %v2320_v42 = vrot.slane %v2292_v39, %v4295_v21  ;;  %v2296_v44 = vcombine.high %v2292_v39, %v2292_v39 }
 0x8d4   :  { %2024 = vadd.xlane.f32.xlu1 %v2023_v13  ;;  %v2026_v35 = vsel %vm444_vm9, %v2006_v5, 0.0  ;;  %v2348_v40 = vsel %vm444_vm9, %v2338_v28, 0.0  ;;  %v2340_v41 = vmul.f32 %v4517_v32, %v2312_v29  ;;  %v2316_v46 = vrot.slane %v2278_v37, %v4295_v21 }
 0x8d5   :  { %v2345_v45 = vsel %vm444_vm9, %v2337_v16, 0.0  ;;  %v2339_v47 = vmul.f32 %v4525_v34, %v2308_v36  ;;  %v2294_v48 = vcombine.high %v2278_v37, %v2278_v37  ;;  %v2342_v50 = vmul.f32 %v4553_v43, %v2320_v42 }
 0x8d6   :  { %2021 = vadd.xlane.f32.xlu0 %v2020_v33  ;;  %v2354_v49 = vsel %vm444_vm9, %v2340_v41, 0.0  ;;  %v2328_v51 = vrot.slane %v2296_v44, %v4295_v21  ;;  %v2341_v54 = vmul.f32 %v4579_v52, %v2316_v46 }
 0x8d7   :  { %v2351_v53 = vsel %vm444_vm9, %v2339_v47, 0.0  ;;  %v2324_v55 = vrot.slane %v2294_v48, %v4295_v21  ;;  %v2360_v58 = vsel %vm444_vm9, %v2342_v50, 0.0 }
 0x8d8   :  { %2030 = vadd.xlane.f32.xlu1 %v2029_v26  ;;  %v2344_v59 = vmul.f32 %v4589_v56, %v2328_v51  ;;  %v2357_v61 = vsel %vm444_vm9, %v2341_v54, 0.0 }
 0x8d9   :  { %v2343_v0 = vmul.f32 %v4595_v62, %v2324_v55 }
 0x8da   :  { %2027 = vadd.xlane.f32.xlu0 %v2026_v35  ;;  %v2366_v1 = vsel %vm444_vm9, %v2344_v59, 0.0 }
 0x8db   :  { %v2363_v3 = vsel %vm444_vm9, %v2343_v0, 0.0 }
 0x8dc   :  { %2349 = vadd.xlane.f32.xlu1 %v2348_v40 }
 0x8de   :  { %2346 = vadd.xlane.f32.xlu0 %v2345_v45 }
 0x8e0   :  { %2355 = vadd.xlane.f32.xlu1 %v2354_v49 }
 0x8e2   :  { %2352 = vadd.xlane.f32.xlu0 %v2351_v53 }
 0x8e4   :  { %2361 = vadd.xlane.f32.xlu1 %v2360_v58 }
 0x8e6   :  { %2358 = vadd.xlane.f32.xlu0 %v2357_v61 }
 0x8e8   :  { %2367 = vadd.xlane.f32.xlu1 %v2366_v1 }
 0x8ea   :  { %2364 = vadd.xlane.f32.xlu0 %v2363_v3 }
 0x8f9   :  { %2584 = vrot.lane.b32.xlu1 %v4288_v19, %s4198_s28 }
 0x8fd   :  { %2586 = vrot.lane.b32.xlu1 %v4298_v23, %s4198_s28 }
 0x900   :  { %2588 = vrot.lane.b32.xlu0 %v4302_v24, %s4188_s17 }
 0x959   :  { %v2010_v4 = vpop.xlane.xlu1 %2009 }
 0x95a   :  { %v2047_v35 = vrot.slane %v2010_v4, %v4605_v6 }
 0x95b   :  { %v2013_v30 = vpop.xlane.xlu0 %2012 }
 0x95c   :  { %v2051_v29 = vrot.slane %v2013_v30, %v4605_v6 }
 0x95d   :  { %v2019_v10 = vpop.xlane.xlu1 %2018 }
 0x95e   :  { %v2076_v16 = vsel %vm512_vm1, %v2051_v29, %v2047_v35  ;;  %v2059_v44 = vrot.slane %v2019_v10, %v4605_v6 }
 0x95f   :  { %v2016_v2 = vpop.xlane.xlu0 %2015 }
 0x960   :  { %v2055_v39 = vrot.slane %v2016_v2, %v4605_v6 }
 0x961   :  { %v2025_v11 = vpop.xlane.xlu1 %2024 }
 0x962   :  { %v2077_v37 = vsel %vm514_vm2, %v2055_v39, %v2076_v16  ;;  %v2067_v55 = vrot.slane %v2025_v11, %v4605_v6 }
 0x963   :  { %v2022_v38 = vpop.xlane.xlu0 %2021  ;;  %v2078_v46 = vsel %vm516_vm11, %v2059_v44, %v2077_v37 }
 0x964   :  { %v2063_v40 = vrot.slane %v2022_v38, %v4605_v6 }
 0x965   :  { %v2031_v13 = vpop.xlane.xlu1 %2030 }
 0x966   :  { %v2079_v49 = vsel %vm518_vm7, %v2063_v40, %v2078_v46  ;;  %v2075_v30 = vrot.slane %v2031_v13, %v4605_v6  ;;  %v4988_v13 = vld [vmem:[%s5241_s6] sm:$0xff]  ;;  %s4201_s6 = smov 72  }
 0x967   :  { %v2028_v14 = vpop.xlane.xlu0 %2027  ;;  %v2080_v0 = vsel %vm520_vm12, %v2067_v55, %v2079_v49 }
 0x968   :  { %v2071_v50 = vrot.slane %v2028_v14, %v4605_v6 }
 0x969   :  { %v2350_v15 = vpop.xlane.xlu1 %2349 }
 0x96a   :  { %v2388_v45 = vrot.slane %v2350_v15, %v4605_v6  ;;  %v2081_v4 = vsel %vm522_vm14, %v2071_v50, %v2080_v0 }
 0x96b   :  { %v2347_v9 = vpop.xlane.xlu0 %2346  ;;  %v2082_v2 = vsel %vm524_vm0, %v2075_v30, %v2081_v4 }
 0x96c   :  { %v2384_v36 = vrot.slane %v2347_v9, %v4605_v6 }
 0x96d   :  { %v2356_v33 = vpop.xlane.xlu1 %2355 }
 0x96e   :  { %v2413_v48 = vsel %vm512_vm1, %v2388_v45, %v2384_v36  ;;  %v2396_v58 = vrot.slane %v2356_v33, %v4605_v6 }
 0x96f   :  { %v2353_v5 = vpop.xlane.xlu0 %2352 }
 0x970   :  { %v2392_v41 = vrot.slane %v2353_v5, %v4605_v6 }
 0x971   :  { %v2362_v22 = vpop.xlane.xlu1 %2361 }
 0x972   :  { %v2414_v51 = vsel %vm514_vm2, %v2392_v41, %v2413_v48  ;;  %v2404_v10 = vrot.slane %v2362_v22, %v4605_v6 }
 0x973   :  { %v2359_v19 = vpop.xlane.xlu0 %2358  ;;  %v2415_v61 = vsel %vm516_vm11, %v2396_v58, %v2414_v51 }
 0x974   :  { %v2400_v53 = vrot.slane %v2359_v19, %v4605_v6 }
 0x975   :  { %v2368_v25 = vpop.xlane.xlu1 %2367 }
 0x976   :  { %v2416_v1 = vsel %vm518_vm7, %v2400_v53, %v2415_v61  ;;  %v2412_v33 = vrot.slane %v2368_v25, %v4605_v6 }
 0x977   :  { %v2365_v26 = vpop.xlane.xlu0 %2364  ;;  %v2417_v38 = vsel %vm520_vm12, %v2404_v10, %v2416_v1 }
 0x978   :  { %v2408_v3 = vrot.slane %v2365_v26, %v4605_v6 }
 0x979   :  { %v2585_v23 = vpop.permute.xlu1 %2584 }
 0x97a   :  { %3982 = vmatprep.mubr.msk.f32.mxu1 %vm5331_vm13, %v2585_v23  ;;  %v2418_v9 = vsel %vm522_vm14, %v2408_v3, %v2417_v38  ;;  %vm5337_vm13 = vmmov %vm5328_vm3 }
 0x97b   :  { %v2589_v24 = vpop.permute.xlu0 %2588  ;;  %v2419_v19 = vsel %vm524_vm0, %v2412_v33, %v2418_v9 }
 0x97c   :  { %3980 = vmatprep.subr.msk.mxu1 %vm5332_vm15, %v2589_v24  ;;  %vm5338_vm15 = vcmask 1046528  }
 0x97d   :  { %3981 = vmatpush3.xpose.msk.msra.mxu1 %vm5333_vm6, %v2589_v24  ;;  %v2587_v28 = vpop.permute.xlu1 %2586  ;;  %vm5339_vm6 = vmmov %vm5338_vm15 }
 0x97e   :  { %3990 = vmatprep.subr.mxu1 %v4185_v7 }
 0x980   :  { %3983 = vmatmul.mubr.msk.f32.vlgmr.msra.gmra.mrb[18].mxu1 %vm5334_vm4, %v2587_v28  ;;  %vm5340_vm4 = vmmov %vm5328_vm3 }
 0x981   :  { %3992 = vmatprep.mubr.msk.f32.mxu1 %vm5300_vm10, %v4185_v7 }
 0x996   :  { %v4959_v42 = vpop.f32.mrb[10].mxu1 }
 0x997   :  { %v3944_v47 = vpop.f32.mrb[11].mxu1 }
 0x99a   :  { %v4969_v54 = vpop.f32.mrb[12].mxu1 }
 0x99b   :  { %v3954_v59 = vpop.f32.mrb[13].mxu1 }
 0x9a1   :  { %v2154_v11 = vpop.f32.mrb[14].mxu1 }
 0x9a2   :  { %v2155_v14 = vadd.f32 %v2154_v11, %v2082_v2  ;;  %v3964_v15 = vpop.f32.mrb[15].mxu1 }
 0x9a4   :  { %v2158_v5 = vmul.f32 0.35355338, %v2155_v14 }
 0x9a5   :  { %v2491_v26 = vpop.f32.mrb[16].mxu1 }
 0x9a6   :  { %v2492_v23 = vadd.f32 %v2491_v26, %v2419_v19  ;;  %v3974_v24 = vpop.f32.mrb[17].mxu1  ;;  %v2159_v22 = vadd.f32 %v4988_v13, %v2158_v5 }
 0x9a8   :  { %v2495_v28 = vmul.f32 0.35355338, %v2492_v23  ;;  %v2160_v29 = vsel %vm5328_vm3, %v2159_v22, -inf }
 0x9a9   :  { %2161 = vmax.xlane.f32.xlu0 %v2160_v29 }
 0x9aa   :  { %v2496_v39 = vadd.f32 %v4988_v13, %v2495_v28 }
 0x9ac   :  { %v2497_v25 = vsel %vm5335_vm8, %v2496_v39, -inf  ;;  %vm5341_vm8 = vmmov %vm5328_vm3 }
 0x9ad   :  { %2498 = vmax.xlane.f32.xlu1 %v2497_v25 }
 0x9be   :  { %2171 = vrot.lane.b32.xlu1 %v4285_v17, %s4199_s8 }
 0x9c2   :  { %2812 = vrot.lane.b32.xlu1 %v4285_v17, %s4200_s9 }
 0x9c6   :  { %2810 = vrot.lane.b32.xlu1 %v4315_v31, %s4198_s28 }
 0x9ca   :  { %3147 = vrot.lane.b32.xlu1 %v4636_v60, %s4198_s28 }
 0xa36   :  { %v2162_v35 = vpop.xlane.xlu0 %2161 }
 0xa37   :  { %v2163_v16 = vsub.f32 %v2159_v22, %v2162_v35 }
 0xa39   :  { %v2164_v36 = vmul.f32 1.442695, %v2163_v16 }
 0xa3a   :  { %v2499_v37 = vpop.xlane.xlu1 %2498 }
 0xa3b   :  { %4131 = vpow2.f32 %v2164_v36  ;;  %v2500_v40 = vsub.f32 %v2496_v39, %v2499_v37 }
 0xa3d   :  { %v2501_v41 = vmul.f32 1.442695, %v2500_v40 }
 0xa3e   :  { %v2172_v44 = vpop.permute.xlu1 %2171 }
 0xa3f   :  { %4133 = vpow2.f32 %v2501_v41  ;;  %3966 = vmatpush3.msra.mxu0 %v2172_v44 }
 0xa40   :  { %3975 = vmatprep.subr.mxu0 %v4185_v7 }
 0xa42   :  { %v2813_v55 = vpop.permute.xlu1 %2812 }
 0xa45   :  { %v4132_v45 = vpop.eup %4131 }
 0xa46   :  { %v2166_v47 = vsel %vm5336_vm5, %v4132_v45, 0.0  ;;  %v2811_v59 = vpop.permute.xlu1 %2810  ;;  %vm5342_vm5 = vmmov %vm5328_vm3 }
 0xa47   :  { %2167 = vadd.xlane.f32.xlu0 %v2166_v47 }
 0xa49   :  { %v4134_v31 = vpop.eup %4133 }
 0xa4a   :  { %v2503_v46 = vsel %vm5337_vm13, %v4134_v31, 0.0  ;;  %v3148_v1 = vpop.permute.xlu1 %3147  ;;  %vm5343_vm13 = vmmov %vm5328_vm3 }
 0xa4b   :  { %2504 = vadd.xlane.f32.xlu0 %v2503_v46 }
 0xa53   :  { %v3984_v60 = vpop.f32.mrb[18].mxu1 }
 0xa54   :  { %v2674_v48 = vrot.slane %v3984_v60, 1  ;;  %v2662_v49 = vpop.f32.mrb[19].mxu1 }
 0xa55   :  { %v2673_v50 = vrot.slane %v2662_v49, 1 }
 0xa57   :  { %v2678_v51 = vsel %vm5338_vm15, %v2674_v48, %v2673_v50  ;;  %v2675_v53 = vsel %vm5339_vm6, %v2673_v50, %v2674_v48  ;;  %vm5344_vm15 = vmmov %vm5328_vm3 }
 0xa58   :  { %2682 = vrot.lane.b32.xlu1 %v2678_v51, %s4188_s17  ;;  %vm5345_vm6 = vmmov %vm5328_vm3 }
 0xa61   :  { %2508 = vrot.lane.b32.xlu0 %v4292_v20, %s4199_s8 }
 0xa65   :  { %3149 = vrot.lane.b32.xlu0 %v4292_v20, %s4200_s9 }
 0xa69   :  { %2680 = vrot.lane.b32.xlu0 %v2675_v53, %s4188_s17 }
 0xaca   :  { %v2683_v10 = vpop.permute.xlu1 %2682 }
 0xacb   :  { %v2687_v11 = vsel %vm5328_vm3, %v3984_v60, %v2683_v10 }
 0xacc   :  { %v3033_v5 = vrot.slane %v2687_v11, %v4409_v57  ;;  %v3026_v41 = vcombine.high %v2687_v11, %v2687_v11 }
 0xace   :  { %v3049_v29 = vrot.slane %v3033_v5, %v4409_v57  ;;  %v3041_v44 = vcombine.high %v3033_v5, %v3033_v5  ;;  %v3040_v53 = vrot.slane %v3026_v41, %v4409_v57 }
 0xad0   :  { %v3078_v50 = vrot.slane %v3049_v29, %v4295_v21 }
 0xad4   :  { %v2168_v58 = vpop.xlane.xlu0 %2167 }
 0xad5   :  { %4135 = vrcp.f32 %v2168_v58 }
 0xad8   :  { %v2505_v61 = vpop.xlane.xlu0 %2504 }
 0xad9   :  { %4137 = vrcp.f32 %v2505_v61 }
 0xadc   :  { %v2509_v0 = vpop.permute.xlu0 %2508 }
 0xadf   :  { %v4136_v3 = vpop.eup %4135 }
 0xae0   :  { %v2170_v4 = vmul.f32 %v4136_v3, %v4132_v45  ;;  %v3150_v30 = vpop.permute.xlu0 %3149  ;;  %v3115_v3 = vmul.f32 %v4471_v12, %v3078_v50 }
 0xae2   :  { %3968 = vmatmul.mubr.msk.f32.vlgmr.msra.gmra.mrb[14].mxu0 %vm5340_vm4, %v2170_v4  ;;  %vm5346_vm4 = vmmov %vm5328_vm3 }
 0xae3   :  { %v4138_v2 = vpop.eup %4137  ;;  %3976 = vmatpush3.msra.mxu0 %v2509_v0  ;;  %3977 = vmatprep.mubr.msk.f32.mxu0 %vm5300_vm10, %v4185_v7 }
 0xae4   :  { %v2507_v38 = vmul.f32 %v4138_v2, %v4134_v31  ;;  %v2681_v14 = vpop.permute.xlu0 %2680  ;;  %3985 = vmatprep.subr.mxu0 %v4185_v7 }
 0xae5   :  { %v2686_v15 = vsel %vm5341_vm8, %v2662_v49, %v2681_v14  ;;  %v3123_v14 = vsel %vm444_vm9, %v3115_v3, 0.0 }
 0xae6   :  { %v2689_v9 = vcombine.high %v2686_v15, %v2686_v15  ;;  %v2696_v33 = vrot.slane %v2686_v15, %v4409_v57  ;;  %3978 = vmatmul.mubr.msk.f32.vlgmr.msra.gmra.mrb[16].mxu0 %vm5342_vm5, %v2507_v38  ;;  %v3056_v38 = vrot.slane %v3040_v53, %v4409_v57 }
 0xae7   :  { %3987 = vmatprep.mubr.msk.f32.mxu0 %vm5300_vm10, %v4185_v7 }
 0xae8   :  { %v2703_v19 = vrot.slane %v2689_v9, %v4409_v57  ;;  %v2704_v26 = vcombine.high %v2696_v33, %v2696_v33  ;;  %v2712_v23 = vrot.slane %v2696_v33, %v4409_v57  ;;  %v3042_v9 = vcombine.high %v3040_v53, %v3040_v53 }
 0xaea   :  { %v2719_v24 = vrot.slane %v2703_v19, %v4409_v57  ;;  %v2726_v22 = vrot.slane %v2704_v26, %v4409_v57  ;;  %v2734_v28 = vcombine.high %v2712_v23, %v2712_v23  ;;  %3986 = vmatpush3.xpose.msk.msra.mxu0 %vm5343_vm13, %v2813_v55  ;;  %v2705_v39 = vcombine.high %v2703_v19, %v2703_v19 }
 0xaeb   :  { %3995 = vmatprep.subr.mxu0 %v4185_v7  ;;  %v2741_v25 = vrot.slane %v2712_v23, %v4295_v21  ;;  %v3063_v55 = vrot.slane %v3041_v44, %v4409_v57 }
 0xaec   :  { %v2745_v35 = vrot.slane %v2726_v22, %v4295_v21  ;;  %v2749_v16 = vrot.slane %v2734_v28, %v4295_v21  ;;  %v2757_v36 = vrot.slane %v2719_v24, %v4295_v21  ;;  %v2736_v37 = vcombine.high %v2726_v22, %v2726_v22 }
 0xaed   :  { %3988 = vmatmul.mubr.msk.f32.vlgmr.msra.gmra.mrb[18].mxu0 %vm5344_vm15, %v2811_v59  ;;  %v2778_v40 = vmul.f32 %v4471_v12, %v2741_v25  ;;  %v2733_v60 = vrot.slane %v2705_v39, %v4409_v57  ;;  %v2735_v51 = vcombine.high %v2719_v24, %v2719_v24  ;;  %v3082_v11 = vrot.slane %v3063_v55, %v4295_v21 }
 0xaee   :  { %3996 = vmatpush3.xpose.msk.msra.mxu0 %vm5345_vm6, %v3150_v30  ;;  %3997 = vmatprep.mubr.msk.f32.mxu0 %vm5300_vm10, %v4185_v7  ;;  %v2779_v45 = vmul.f32 %v4490_v18, %v2745_v35  ;;  %v2780_v31 = vmul.f32 %v4525_v34, %v2749_v16  ;;  %v2753_v46 = vrot.slane %v2736_v37, %v4295_v21 }
 0xaef   :  { %v2786_v47 = vsel %vm444_vm9, %v2778_v40, 0.0  ;;  %v2782_v49 = vmul.f32 %v4579_v52, %v2757_v36  ;;  %v2761_v61 = vrot.slane %v2733_v60, %v4295_v21  ;;  %v2765_v4 = vrot.slane %v2735_v51, %v4295_v21 }
 0xaf0   :  { %2787 = vadd.xlane.f32.xlu0 %v2786_v47  ;;  %v2789_v48 = vsel %vm444_vm9, %v2779_v45, 0.0  ;;  %v2792_v58 = vsel %vm444_vm9, %v2780_v31, 0.0  ;;  %v2781_v59 = vmul.f32 %v4517_v32, %v2753_v46  ;;  %v2737_v30 = vcombine.high %v2733_v60, %v2733_v60 }
 0xaf1   :  { %3998 = vmatmul.mubr.msk.f32.vlgmr.msra.gmra.mrb[20].mxu0 %vm5346_vm4, %v3148_v1  ;;  %2790 = vadd.xlane.f32.xlu1 %v2789_v48  ;;  %v2798_v0 = vsel %vm444_vm9, %v2782_v49, 0.0  ;;  %v3071_v1 = vcombine.high %v3049_v29, %v3049_v29  ;;  %v2783_v2 = vmul.f32 %v4553_v43, %v2761_v61  ;;  %v2784_v15 = vmul.f32 %v4595_v62, %v2765_v4 }
 0xaf2   :  { %v2795_v10 = vsel %vm444_vm9, %v2781_v59, 0.0  ;;  %v2769_v12 = vrot.slane %v2737_v30, %v4295_v21  ;;  %v3116_v5 = vmul.f32 %v4490_v18, %v3082_v11  ;;  %v3073_v26 = vcombine.high %v3063_v55, %v3063_v55 }
 0xaf3   :  { %v2801_v33 = vsel %vm444_vm9, %v2783_v2, 0.0  ;;  %v3086_v19 = vrot.slane %v3071_v1, %v4295_v21  ;;  %v2804_v23 = vsel %vm444_vm9, %v2784_v15, 0.0  ;;  %v3094_v22 = vrot.slane %v3056_v38, %v4295_v21 }
 0xaf4   :  { %2793 = vadd.xlane.f32.xlu0 %v2792_v58  ;;  %v2785_v24 = vmul.f32 %v4589_v56, %v2769_v12  ;;  %v3072_v28 = vcombine.high %v3056_v38, %v3056_v38  ;;  %v3126_v29 = vsel %vm444_vm9, %v3116_v5, 0.0  ;;  %v3090_v25 = vrot.slane %v3073_v26, %v4295_v21 }
 0xaf5   :  { %2799 = vadd.xlane.f32.xlu1 %v2798_v0  ;;  %v3117_v39 = vmul.f32 %v4525_v34, %v3086_v19  ;;  %v3070_v18 = vrot.slane %v3042_v9, %v4409_v57  ;;  %v3119_v16 = vmul.f32 %v4579_v52, %v3094_v22 }
 0xaf6   :  { %v2807_v35 = vsel %vm444_vm9, %v2785_v24, 0.0  ;;  %v3102_v36 = vrot.slane %v3072_v28, %v4295_v21  ;;  %v3118_v40 = vmul.f32 %v4517_v32, %v3090_v25 }
 0xaf7   :  { %v3129_v37 = vsel %vm444_vm9, %v3117_v39, 0.0  ;;  %v3098_v41 = vrot.slane %v3070_v18, %v4295_v21  ;;  %v3074_v44 = vcombine.high %v3070_v18, %v3070_v18  ;;  %v3135_v34 = vsel %vm444_vm9, %v3119_v16, 0.0 }
 0xaf8   :  { %2796 = vadd.xlane.f32.xlu0 %v2795_v10  ;;  %v3121_v57 = vmul.f32 %v4595_v62, %v3102_v36  ;;  %v3132_v45 = vsel %vm444_vm9, %v3118_v40, 0.0 }
 0xaf9   :  { %3124 = vadd.xlane.f32.xlu1 %v3123_v14  ;;  %v3120_v52 = vmul.f32 %v4553_v43, %v3098_v41  ;;  %v3106_v47 = vrot.slane %v3074_v44, %v4295_v21 }
 0xafa   :  { %v3141_v31 = vsel %vm444_vm9, %v3121_v57, 0.0 }
 0xafb   :  { %v3138_v32 = vsel %vm444_vm9, %v3120_v52, 0.0  ;;  %v3122_v46 = vmul.f32 %v4589_v56, %v3106_v47 }
 0xafc   :  { %2802 = vadd.xlane.f32.xlu0 %v2801_v33 }
 0xafd   :  { %2805 = vadd.xlane.f32.xlu1 %v2804_v23  ;;  %v3144_v60 = vsel %vm444_vm9, %v3122_v46, 0.0 }
 0xb00   :  { %3127 = vadd.xlane.f32.xlu0 %v3126_v29 }
 0xb01   :  { %2808 = vadd.xlane.f32.xlu1 %v2807_v35 }
 0xb04   :  { %3130 = vadd.xlane.f32.xlu0 %v3129_v37 }
 0xb05   :  { %3136 = vadd.xlane.f32.xlu1 %v3135_v34 }
 0xb08   :  { %3133 = vadd.xlane.f32.xlu0 %v3132_v45 }
 0xb09   :  { %3142 = vadd.xlane.f32.xlu1 %v3141_v31 }
 0xb0c   :  { %3139 = vadd.xlane.f32.xlu0 %v3138_v32 }
 0xb10   :  { %3145 = vadd.xlane.f32.xlu0 %v3144_v60 }
 0xb7d   :  { %v2788_v62 = vpop.xlane.xlu0 %2787 }
 0xb7e   :  { %v2791_v50 = vpop.xlane.xlu1 %2790  ;;  %v2825_v0 = vrot.slane %v2788_v62, %v4605_v6 }
 0xb7f   :  { %v2829_v59 = vrot.slane %v2791_v50, %v4605_v6 }
 0xb81   :  { %v2794_v48 = vpop.xlane.xlu0 %2793  ;;  %v2854_v4 = vsel %vm512_vm1, %v2829_v59, %v2825_v0 }
 0xb82   :  { %v2800_v43 = vpop.xlane.xlu1 %2799  ;;  %v2833_v3 = vrot.slane %v2794_v48, %v4605_v6 }
 0xb83   :  { %v2841_v19 = vrot.slane %v2800_v43, %v4605_v6 }
 0xb84   :  { %v2855_v11 = vsel %vm514_vm2, %v2833_v3, %v2854_v4 }
 0xb85   :  { %v2797_v49 = vpop.xlane.xlu0 %2796 }
 0xb86   :  { %v3125_v21 = vpop.xlane.xlu1 %3124  ;;  %v2837_v30 = vrot.slane %v2797_v49, %v4605_v6 }
 0xb87   :  { %v3162_v12 = vrot.slane %v3125_v21, %v4605_v6 }
 0xb88   :  { %v2856_v15 = vsel %vm516_vm11, %v2837_v30, %v2855_v11 }
 0xb89   :  { %v2803_v51 = vpop.xlane.xlu0 %2802  ;;  %v2857_v22 = vsel %vm518_vm7, %v2841_v19, %v2856_v15 }
 0xb8a   :  { %v2806_v58 = vpop.xlane.xlu1 %2805  ;;  %v2845_v9 = vrot.slane %v2803_v51, %v4605_v6 }
 0xb8b   :  { %v2849_v28 = vrot.slane %v2806_v58, %v4605_v6 }
 0xb8c   :  { %v2858_v39 = vsel %vm520_vm12, %v2845_v9, %v2857_v22 }
 0xb8d   :  { %v3128_v53 = vpop.xlane.xlu0 %3127  ;;  %v2859_v41 = vsel %vm522_vm14, %v2849_v28, %v2858_v39 }
 0xb8e   :  { %v2809_v56 = vpop.xlane.xlu1 %2808  ;;  %v3166_v10 = vrot.slane %v3128_v53, %v4605_v6 }
 0xb8f   :  { %v2853_v25 = vrot.slane %v2809_v56, %v4605_v6 }
 0xb90   :  { %v3191_v23 = vsel %vm512_vm1, %v3166_v10, %v3162_v12  ;;  %vm5347_vm1 = vmmov %vm5328_vm3  ;;  %v36_v12 = vld [vmem:[%s5238_s3 + $0x10] sm:$0xff]  ;;  %vm5354_vm3 = vcmask 261120  }
 0xb91   :  { %v3131_v55 = vpop.xlane.xlu0 %3130  ;;  %v2860_v57 = vsel %vm524_vm0, %v2853_v25, %v2859_v41  ;;  %vm5355_vm8 = vmmov %vm5347_vm1 }
 0xb92   :  { %v3170_v38 = vrot.slane %v3131_v55, %v4605_v6  ;;  %v3137_v33 = vpop.xlane.xlu1 %3136  ;;  %vm5356_vm5 = vmmov %vm5354_vm3 }
 0xb93   :  { %v3178_v16 = vrot.slane %v3137_v33, %v4605_v6  ;;  %vm5357_vm13 = vmmov %vm5354_vm3 }
 0xb94   :  { %v3192_v29 = vsel %vm514_vm2, %v3170_v38, %v3191_v23  ;;  %vm5348_vm2 = vmmov %vm5347_vm1  ;;  %v35_v38 = vld [vmem:[%s5238_s3 + $0x8] sm:$0xff] }
 0xb95   :  { %v3134_v61 = vpop.xlane.xlu0 %3133  ;;  %vm5359_vm15 = vmmov %vm5354_vm3 }
 0xb96   :  { %v3174_v5 = vrot.slane %v3134_v61, %v4605_v6  ;;  %v3143_v37 = vpop.xlane.xlu1 %3142  ;;  %vm5360_vm6 = vmmov %vm5354_vm3 }
 0xb97   :  { %v3186_v52 = vrot.slane %v3143_v37, %v4605_v6  ;;  %vm5361_vm4 = vmmov %vm5354_vm3 }
 0xb98   :  { %v3193_v18 = vsel %vm516_vm11, %v3174_v5, %v3192_v29  ;;  %vm5349_vm11 = vmmov %vm5347_vm1 }
 0xb99   :  { %v3140_v14 = vpop.xlane.xlu0 %3139  ;;  %v3194_v40 = vsel %vm518_vm7, %v3178_v16, %v3193_v18  ;;  %vm5350_vm7 = vmmov %vm5347_vm1 }
 0xb9a   :  { %v3182_v35 = vrot.slane %v3140_v14, %v4605_v6 }
 0xb9c   :  { %v3195_v44 = vsel %vm520_vm12, %v3182_v35, %v3194_v40  ;;  %vm5351_vm12 = vmmov %vm5347_vm1 }
 0xb9d   :  { %v3146_v36 = vpop.xlane.xlu0 %3145  ;;  %v3196_v46 = vsel %vm522_vm14, %v3186_v52, %v3195_v44  ;;  %vm5352_vm14 = vmmov %vm5347_vm1 }
 0xb9e   :  { %v3190_v34 = vrot.slane %v3146_v36, %v4605_v6 }
 0xba0   :  { %v3197_v60 = vsel %vm524_vm0, %v3190_v34, %v3196_v46  ;;  %vm3390_vm0 = vcmask 195584  }
 0xbb5   :  { %v5092_v1 = vpop.f32.mrb[14].mxu0 }
 0xbb6   :  { %v3969_v2 = vpop.f32.mrb[15].mxu0 }
 0xbb9   :  { %v2580_v26 = vpop.f32.mrb[16].mxu0 }
 0xbba   :  { %v3979_v24 = vpop.f32.mrb[17].mxu0 }
 0xbc0   :  { %v2932_v45 = vpop.f32.mrb[18].mxu0 }
 0xbc1   :  { %v2933_v47 = vadd.f32 %v2932_v45, %v2860_v57  ;;  %v3989_v31 = vpop.f32.mrb[19].mxu0  ;;  %v4157_v57 = vld [vmem:[%s5235_s0] sm:$0xff] }
 0xbc3   :  { %v2936_v32 = vmul.f32 0.35355338, %v2933_v47 }
 0xbc4   :  { %v3269_v62 = vpop.f32.mrb[20].mxu0 }
 0xbc5   :  { %v2937_v48 = vadd.f32 %v4988_v13, %v2936_v32  ;;  %v3270_v49 = vadd.f32 %v3269_v62, %v3197_v60  ;;  %v3999_v50 = vpop.f32.mrb[21].mxu0 }
 0xbc7   :  { %v3273_v51 = vmul.f32 0.35355338, %v3270_v49  ;;  %v2938_v43 = vsel %vm5347_vm1, %v2937_v48, -inf }
 0xbc8   :  { %2939 = vmax.xlane.f32.xlu1 %v2938_v43 }
 0xbc9   :  { %v3274_v53 = vadd.f32 %v4988_v13, %v3273_v51 }
 0xbcb   :  { %v3275_v6 = vsel %vm5348_vm2, %v3274_v53, -inf  ;;  %vm3622_vm2 = vcmask 523264  }
 0xbcc   :  { %3276 = vmax.xlane.f32.xlu0 %v3275_v6 }
 0xc55   :  { %v2940_v21 = vpop.xlane.xlu1 %2939 }
 0xc56   :  { %v2941_v55 = vsub.f32 %v2937_v48, %v2940_v21 }
 0xc58   :  { %v2942_v58 = vmul.f32 1.442695, %v2941_v55  ;;  %v38_v55 = vld [vmem:[%s5239_s4] sm:$0xff] }
 0xc59   :  { %v3277_v59 = vpop.xlane.xlu0 %3276 }
 0xc5a   :  { %4139 = vpow2.f32 %v2942_v58  ;;  %v3278_v61 = vsub.f32 %v3274_v53, %v3277_v59  ;;  %v39_v58 = vld [vmem:[%s5239_s4 + $0x8] sm:$0xff]  ;;  %v40_v59 = vld [vmem:[%s5239_s4 + $0x10] sm:$0xff] }
 0xc5c   :  { %v3279_v0 = vmul.f32 1.442695, %v3278_v61  ;;  %v4068_v61 = vpack.c.bf16 %v39_v58, %v38_v55 }
 0xc5e   :  { %4141 = vpow2.f32 %v3279_v0  ;;  %v41_v0 = vld [vmem:[%s5239_s4 + $0x18] sm:$0xff]  ;;  %4069 = vmatprep.subr.bf16.mxu0 %v4068_v61 }
 0xc5f   :  { %4071 = vmatpush3.bf16.msra.mxu0 %v4068_v61 }
 0xc64   :  { %v4140_v56 = vpop.eup %4139 }
 0xc65   :  { %v2944_v3 = vsel %vm5349_vm11, %v4140_v56, 0.0 }
 0xc66   :  { %2945 = vadd.xlane.f32.xlu1 %v2944_v3  ;;  %v42_v3 = vld [vmem:[%s5239_s4 + $0x20] sm:$0xff] }
 0xc68   :  { %v4142_v4 = vpop.eup %4141 }
 0xc69   :  { %v3281_v30 = vsel %vm5350_vm7, %v4142_v4, 0.0 }
 0xc6a   :  { %3282 = vadd.xlane.f32.xlu0 %v3281_v30 }
 0xc77   :  { %2949 = vrot.lane.b32.xlu1 %v4285_v17, %s4201_s6 }
 0xc7b   :  { %3364 = vrot.lane.b32.xlu1 %v4959_v42, %s4188_s17 }
 0xc7f   :  { %3366 = vrot.lane.b32.xlu1 %v4969_v54, %s4188_s17 }
 0xc80   :  { %3286 = vrot.lane.b32.xlu0 %v4292_v20, %s4201_s6 }
 0xc83   :  { %3374 = vrot.lane.b32.xlu1 %v2580_v26, %s4194_s24 }
 0xc84   :  { %3372 = vrot.lane.b32.xlu0 %v5092_v1, %s4194_s24  ;;  %v34_v1 = vld [vmem:[%s5238_s3] sm:$0xff] }
 0xc85   :  { %v4105_v14 = vpack.i.bf16 %v35_v38, %v34_v1  ;;  %v4052_v15 = vpack.c.bf16 %v35_v38, %v34_v1 }
 0xcf3   :  { %v2946_v13 = vpop.xlane.xlu1 %2945 }
 0xcf4   :  { %4143 = vrcp.f32 %v2946_v13 }
 0xcf7   :  { %v3283_v10 = vpop.xlane.xlu0 %3282  ;;  %v2950_v2 = vpop.permute.xlu1 %2949 }
 0xcf8   :  { %4145 = vrcp.f32 %v3283_v10  ;;  %3991 = vmatpush3.msra.mxu1 %v2950_v2 }
 0xcf9   :  { %4000 = vmatprep.subr.mxu1 %v4185_v7 }
 0xcfb   :  { %v3287_v11 = vpop.permute.xlu0 %3286  ;;  %v3365_v24 = vpop.permute.xlu1 %3364 }
 0xcfe   :  { %v4144_v17 = vpop.eup %4143 }
 0xcff   :  { %v2948_v42 = vmul.f32 %v4144_v17, %v4140_v56  ;;  %v3367_v22 = vpop.permute.xlu1 %3366  ;;  %v3373_v28 = vpop.permute.xlu0 %3372  ;;  %v4072_v56 = vpack.c.bf16 %v41_v0, %v40_v59 }
 0xd00   :  { %v3387_v16 = vsel %vm5355_vm8, %v4831_v63, %v3367_v22 }
 0xd01   :  { %3993 = vmatmul.mubr.msk.f32.vlgmr.msra.gmra.mrb[20].mxu1 %vm5351_vm12, %v2948_v42  ;;  %4073 = vmatprep.subr.bf16.mxu0 %v4072_v56 }
 0xd02   :  { %v4146_v54 = vpop.eup %4145  ;;  %4001 = vmatpush3.msra.mxu1 %v3287_v11  ;;  %4002 = vmatprep.mubr.msk.f32.mxu1 %vm5300_vm10, %v4185_v7  ;;  %v37_v7 = vld [vmem:[%s5238_s3 + $0x18] sm:$0xff]  ;;  %vm5353_vm10 = vmmov %vm5347_vm1 }
 0xd03   :  { %v3285_v20 = vmul.f32 %v4146_v54, %v4142_v4  ;;  %4053 = vmatprep.subr.bf16.mxu1 %v4052_v15  ;;  %v4110_v9 = vpack.i.bf16 %v37_v7, %v36_v12  ;;  %v4056_v33 = vpack.c.bf16 %v37_v7, %v36_v12  ;;  %v3386_v29 = vsel %vm5353_vm10, %v4704_v27, %v3365_v24  ;;  %v3375_v25 = vpop.permute.xlu1 %3374  ;;  %v4156_v27 = vld [vmem:[%s5235_s0 + $0x8] sm:$0xff]  ;;  %v5195_v7 = vld [vmem:[%s5240_s5] sm:$0xff]  ;;  %vm5362_vm1 = vmmov %vm5354_vm3 }
 0xd04   :  { %v3388_v39 = vsel %vm444_vm9, %v3386_v29, %v3373_v28  ;;  %v3389_v36 = vsel %vm444_vm9, %v3387_v16, %v3375_v25  ;;  %vm5358_vm9 = vmmov %vm5354_vm3  ;;  %v43_v4 = vld [vmem:[%s5239_s4 + $0x28] sm:$0xff]  ;;  %4075 = vmatpush3.bf16.msra.mxu0 %v4072_v56  ;;  %v44_v29 = vld [vmem:[%s5239_s4 + $0x30] sm:$0xff] }
 0xd05   :  { %4003 = vmatmul.mubr.msk.f32.vlgmr.msra.gmra.mrb[22].mxu1 %vm5352_vm14, %v3285_v20  ;;  %v4076_v30 = vpack.c.bf16 %v43_v4, %v42_v3  ;;  %vm5363_vm11 = vmmov %vm5362_vm1  ;;  %v3734_v3 = vsub.s32 6, %v4259_v8  ;;  %v3740_v4 = vsub.s32 7, %v4259_v8 }
 0xd06   :  { %4055 = vmatpush3.bf16.msra.mxu1 %v4052_v15  ;;  %vm5364_vm7 = vmmov %vm5362_vm1 }
 0xd07   :  { %4057 = vmatprep.subr.bf16.mxu1 %v4056_v33  ;;  %4077 = vmatprep.subr.bf16.mxu0 %v4076_v30  ;;  %vm5365_vm12 = vmmov %vm5362_vm1 }
 0xd08   :  { %4079 = vmatpush3.bf16.msra.mxu0 %v4076_v30  ;;  %vm5366_vm14 = vmmov %vm5362_vm1  ;;  %v3735_v30 = vrot.slane %v5195_v7, %v3734_v3 }
 0xd0a   :  { %4059 = vmatpush3.bf16.msra.mxu1 %v4056_v33  ;;  %v3511_v33 = vsub.s32 3, %v4259_v8 }
 0xdd4   :  { %v3021_v5 = vpop.f32.mrb[20].mxu1 }
 0xdd5   :  { %3380 = vrot.lane.b32.xlu0 %v3021_v5, %s4191_s21  ;;  %v3994_v19 = vpop.f32.mrb[21].mxu1 }
 0xdd8   :  { %v3358_v26 = vpop.f32.mrb[22].mxu1 }
 0xdd9   :  { %3382 = vrot.lane.b32.xlu1 %v3358_v26, %s4191_s21  ;;  %v4004_v23 = vpop.f32.mrb[23].mxu1 }
 0xdda   :  { %v3512_v23 = vrot.slane %v5195_v7, %v3511_v33 }
 0xe47   :  { %v3381_v18 = vpop.permute.xlu0 %3380 }
 0xe48   :  { %v3391_v35 = vsel %vm3390_vm0, %v3388_v39, %v3381_v18  ;;  %v45_v39 = vld [vmem:[%s5239_s4 + $0x38] sm:$0xff]  ;;  %v3517_v18 = vsub.s32 4, %v4259_v8  ;;  %s4202_s4 = smov [#allocation2]  }
 0xe49   :  { %4013 = vmatprep.mubr.msk.f32.mxu1 %vm5354_vm3, %v3391_v35  ;;  %v4080_v25 = vpack.c.bf16 %v45_v39, %v44_v29  ;;  %s3751_s11 = sshll.u32 %s4202_s4, 4  ;;  %s3752_s11 = int_to_ptr.vmem [resolvable:$true] %s3751_s11 }
 0xe4a   :  { %v3518_v35 = vrot.slane %v5195_v7, %v3517_v18  ;;  %s4159_s12 = scalar_lea.vmem %s3752_s11, 256  ;;  %p4164_p1 = scmp.lt.s32.totalorder %s3752_s11, %s3752_s11 }
 0xe4b   :  { %v3383_v37 = vpop.permute.xlu1 %3382  ;;  %4081 = vmatprep.subr.bf16.mxu0 %v4080_v25  ;;  %p4160_p0 = scmp.ne.s32.totalorder %s3752_s11, %s4159_s12  ;;  %p4165_p2 = scmp.lt.s32.totalorder %s4159_s12, %s4159_s12 }
 0xe4c   :  { %v3392_v40 = vsel %vm3390_vm0, %v3389_v36, %v3383_v37  ;;  %4083 = vmatpush3.bf16.msra.mxu0 %v4080_v25  ;;  %vm5367_vm0 = vmmov %vm5362_vm1 }
 0xe4d   :  { %4014 = vmatmul.mubr.msk.f32.vlgmr.msra.gmra.mrb[24].mxu1 %vm5356_vm5, %v3392_v40  ;;  %vm5368_vm10 = vmmov %vm5367_vm0  ;;  %p4166_p3 = por %p4165_p2, %p4164_p1 }
 0xe4f   :  { %p4167_p4 = pnand %p4166_p3, %p4160_p0 }
 0xf20   :  { %v4015_v41 = vpop.f32.mrb[24].mxu1 }
 0xf21   :  { %v3475_v44 = vadd.f32 %v4156_v27, %v4015_v41  ;;  %v3465_v34 = vpop.f32.mrb[25].mxu1 }
 0xf22   :  { %v3474_v45 = vadd.f32 %v4157_v57, %v3465_v34 }
 0xf23   :  { %v3479_v63 = vsel %vm5357_vm13, %v3475_v44, 0.0 }
 0xf24   :  { %3480 = vadd.xlane.f32.xlu1 %v3479_v63  ;;  %v3476_v52 = vsel %vm5358_vm9, %v3474_v45, 0.0 }
 0xf25   :  { %3477 = vadd.xlane.f32.xlu0 %v3476_v52 }
 0xf35   :  { %4106 = vrot.lane.b32.xlu1 %v4105_v14, %s4190_s20  ;;  %v3505_v14 = vsub.s32 2, %v4259_v8 }
 0xfb1   :  { %v3481_v47 = vpop.xlane.xlu1 %3480 }
 0xfb2   :  { %v3484_v31 = vmul.f32 0.03125, %v3481_v47  ;;  %v3478_v32 = vpop.xlane.xlu0 %3477 }
 0xfb3   :  { %v3483_v46 = vmul.f32 0.03125, %v3478_v32 }
 0xfb4   :  { %v3486_v60 = vsub.f32 %v3475_v44, %v3484_v31  ;;  %v3620_v44 = vsub.s32 5, %v4259_v8 }
 0xfb5   :  { %v3485_v62 = vsub.f32 %v3474_v45, %v3483_v46  ;;  %v4107_v43 = vpop.permute.xlu1 %4106 }
 0xfb6   :  { %v3488_v48 = vmul.f32 %v3486_v60, %v3486_v60  ;;  %v4109_v53 = vunpack.i.h.bf16 %v4107_v43  ;;  %v4108_v6 = vunpack.i.l.bf16 %v4107_v43  ;;  %v3621_v34 = vrot.slane %v5195_v7, %v3620_v44 }
 0xfb7   :  { %v3487_v50 = vmul.f32 %v3485_v62, %v3485_v62 }
 0xfb8   :  { %v3492_v49 = vsel %vm5359_vm15, %v3488_v48, 0.0  ;;  %v4060_v21 = vpack.c.bf16 %v4109_v53, %v4108_v6 }
 0xfb9   :  { %3493 = vadd.xlane.f32.xlu0 %v3492_v49  ;;  %v3489_v51 = vsel %vm5360_vm6, %v3487_v50, 0.0 }
 0xfba   :  { %4061 = vmatprep.subr.bf16.mxu1 %v4060_v21 }
 0xfbb   :  { %4063 = vmatpush3.bf16.msra.mxu1 %v4060_v21 }
 0xfbd   :  { %3490 = vadd.xlane.f32.xlu0 %v3489_v51 }
 0xfd3   :  { %4111 = vrot.lane.b32.xlu0 %v4110_v9, %s4190_s20  ;;  %v3506_v9 = vrot.slane %v5195_v7, %v3505_v14 }
0x1046   :  { %v3494_v13 = vpop.xlane.xlu0 %3493 }
0x1047   :  { %v3496_v10 = vmul.f32 0.03125, %v3494_v13 }
0x1049   :  { %v3498_v2 = vadd.f32 1e-05, %v3496_v10 }
0x104a   :  { %v3491_v17 = vpop.xlane.xlu0 %3490 }
0x104b   :  { %4147 = vrsqrt.f32 %v3498_v2  ;;  %v3495_v42 = vmul.f32 0.03125, %v3491_v17  ;;  %v3741_v17 = vrot.slane %v5195_v7, %v3740_v4 }
0x104d   :  { %v3497_v11 = vadd.f32 1e-05, %v3495_v42 }
0x104e   :  { %v4112_v54 = vpop.permute.xlu0 %4111 }
0x104f   :  { %4149 = vrsqrt.f32 %v3497_v11  ;;  %v4114_v20 = vunpack.i.h.bf16 %v4112_v54  ;;  %v4113_v1 = vunpack.i.l.bf16 %v4112_v54 }
0x1051   :  { %v4064_v38 = vpack.c.bf16 %v4114_v20, %v4113_v1 }
0x1053   :  { %4065 = vmatprep.subr.bf16.mxu1 %v4064_v38 }
0x1054   :  { %4067 = vmatpush3.bf16.msra.mxu1 %v4064_v38 }
0x1055   :  { %v4148_v15 = vpop.eup %4147 }
0x1056   :  { %v3502_v12 = vmul.f32 %v4148_v15, %v3486_v60 }
0x1058   :  { %v3508_v26 = vmul.f32 %v3506_v9, %v3502_v12 }
0x1059   :  { %v4150_v5 = vpop.eup %4149 }
0x105a   :  { %v3501_v19 = vmul.f32 %v4150_v5, %v3485_v62  ;;  %v3514_v28 = vadd.f32 %v3512_v23, %v3508_v26 }
0x105c   :  { %v3507_v24 = vmul.f32 %v3506_v9, %v3501_v19 }
0x105e   :  { %v3513_v22 = vadd.f32 %v3512_v23, %v3507_v24 }
0x1060   :  { %4024 = vmatprep.mubr.msk.f32.mxu1 %vm5361_vm4, %v3513_v22 }
0x1061   :  { %4025 = vmatmul.mubr.msk.f32.vlgmr.msra.gmra.mrb[26].mxu1 %vm5362_vm1, %v3514_v28 }
0x1134   :  { %v4026_v16 = vpop.f32.mrb[26].mxu1 }
0x1135   :  { %v3613_v36 = vadd.f32 %v4026_v16, %v3518_v35  ;;  %v3607_v37 = vpop.f32.mrb[27].mxu1 }
0x1136   :  { %v3608_v40 = vadd.f32 %v3607_v37, %v3518_v35 }
0x1137   :  { %v3617_v27 = vmax.f32 %v3613_v36, 0.0 }
0x1138   :  { %v3616_v41 = vmax.f32 %v3608_v40, 0.0 }
0x113a   :  { %4043 = vmatprep.mubr.msk.f32.mxu0 %vm3622_vm2, %v3616_v41 }
0x113b   :  { %4044 = vmatmul.mubr.msk.f32.vlgmr.msra.gmra.mrb[22].mxu0 %vm3622_vm2, %v3617_v27 }
0x120e   :  { %v4045_v57 = vpop.f32.mrb[22].mxu0 }
0x120f   :  { %v3701_v45 = vadd.f32 %v4045_v57, %v3621_v34  ;;  %v3695_v63 = vpop.f32.mrb[23].mxu0 }
0x1210   :  { %v3696_v52 = vadd.f32 %v3695_v63, %v3621_v34 }
0x1211   :  { %v3705_v47 = vadd.f32 %v3701_v45, %v3514_v28 }
0x1212   :  { %v3704_v31 = vadd.f32 %v3696_v52, %v3513_v22 }
0x1213   :  { %v3709_v32 = vsel %vm5363_vm11, %v3705_v47, 0.0 }
0x1214   :  { %3710 = vadd.xlane.f32.xlu0 %v3709_v32  ;;  %v3706_v46 = vsel %vm5364_vm7, %v3704_v31, 0.0 }
0x1215   :  { %3707 = vadd.xlane.f32.xlu1 %v3706_v46 }
0x12a1   :  { %v3711_v60 = vpop.xlane.xlu0 %3710 }
0x12a2   :  { %v3713_v62 = vmul.f32 0.03125, %v3711_v60  ;;  %v3708_v48 = vpop.xlane.xlu1 %3707 }
0x12a3   :  { %v3712_v49 = vmul.f32 0.03125, %v3708_v48 }
0x12a4   :  { %v3715_v50 = vsub.f32 %v3705_v47, %v3713_v62 }
0x12a5   :  { %v3714_v51 = vsub.f32 %v3704_v31, %v3712_v49 }
0x12a6   :  { %v3717_v43 = vmul.f32 %v3715_v50, %v3715_v50 }
0x12a7   :  { %v3716_v53 = vmul.f32 %v3714_v51, %v3714_v51 }
0x12a8   :  { %v3721_v6 = vsel %vm5365_vm12, %v3717_v43, 0.0 }
0x12a9   :  { %3722 = vadd.xlane.f32.xlu0 %v3721_v6  ;;  %v3718_v21 = vsel %vm5366_vm14, %v3716_v53, 0.0 }
0x12aa   :  { %3719 = vadd.xlane.f32.xlu1 %v3718_v21 }
0x1336   :  { %v3723_v55 = vpop.xlane.xlu0 %3722 }
0x1337   :  { %v3725_v58 = vmul.f32 0.03125, %v3723_v55  ;;  %v3720_v59 = vpop.xlane.xlu1 %3719 }
0x1338   :  { %v3724_v61 = vmul.f32 0.03125, %v3720_v59 }
0x1339   :  { %v3727_v0 = vadd.f32 1e-05, %v3725_v58 }
0x133a   :  { %v3726_v56 = vadd.f32 1e-05, %v3724_v61 }
0x133b   :  { %4151 = vrsqrt.f32 %v3727_v0 }
0x133c   :  { %4153 = vrsqrt.f32 %v3726_v56 }
0x1345   :  { %v4152_v13 = vpop.eup %4151 }
0x1346   :  { %v4154_v10 = vpop.eup %4153  ;;  %v3731_v2 = vmul.f32 %v4152_v13, %v3715_v50 }
0x1347   :  { %v3730_v42 = vmul.f32 %v4154_v10, %v3714_v51 }
0x1348   :  { %v3737_v11 = vmul.f32 %v3735_v30, %v3731_v2 }
0x1349   :  { %v3736_v54 = vmul.f32 %v3735_v30, %v3730_v42 }
0x134a   :  { %v3743_v20 = vadd.f32 %v3741_v17, %v3737_v11 }
0x134b   :  { %v3742_v1 = vadd.f32 %v3741_v17, %v3736_v54 }
0x134c   :  { %3745 = vst.msk [vmem:[#allocation2 + $0x8] sm:$0xff] %vm5367_vm0, %v3743_v20 }
0x134d   :  { %3744 = vst.msk [vmem:[#allocation2] sm:$0xff] %vm5368_vm10, %v3742_v1 }
0x134e   :  { %4170 = shalt.err (!%p4167_p4)
}
0x134f   :  { %s4171_s15 = scalar_lea.hbm %s5242_s7, 256 }
0x1350   :  { %p4172_p5 = scmp.ne.s32.totalorder %s5242_s7, %s4171_s15  ;;  %p4175_p6 = scmp.lt.u32.totalorder %s4171_s15, %s5242_s7 }
0x1352   :  { %p4177_p7 = pnand %p4175_p6, %p4172_p5 }
0x1354   :  { %4180 = shalt.err (!%p4177_p7)
}
0x1355   :  { %s4203_s19 = smov 128  }
0x1356   :  { %3757 = dma.vmem_to_hbm [thread:$0]  %s3752_s11, 256, %s5242_s7, [#allocation3], %s4203_s19, %s4203_s19, %s4188_s17  }
0x1357   :  { %4181 = dma.done.wait [#allocation3], 256  }
0x1358   :  { %4182 = vsyncadd [#allocation3], 4294967040 }
0x1359   :  { %3761 = vsyncpa [#allocation3], 1 }

</bundles_post_ra>
